<compile_context>
chip_gen: v7x
topology: tpu7x:2x2x1
jax: 0.10.0
libtpu: 0.0.40
codegen_flags: <defaults>
</compile_context>

<pallas_src>
import functools

import jax
import jax.numpy as jnp
from jax import lax
from jax.experimental import pallas as pl
from jax.experimental.pallas import tpu as pltpu

VOCAB_CHUNK = 128   # one lane-width of vocab ids per counts/matmul step


def bag_of_ngrams_kernel(idx_ref, emb_ref, w1_ref, b1_ref, w2_ref, b2_ref,
                         out_ref, *, vocab_chunk):
    idx = idx_ref[...]                       # (TB, S) int32
    TB, S = idx.shape
    V, E = emb_ref.shape                     # V already padded to vocab_chunk
    n_chunks = V // vocab_chunk

    # Lane-id template, hoisted out of the chunk loop (JAX does not CSE it).
    lane_ids = lax.broadcasted_iota(jnp.int32, (TB, vocab_chunk), 1)

    def chunk_body(c, bag):
        base = pl.multiple_of(c * vocab_chunk, vocab_chunk)
        vocab_ids = lane_ids + base          # ids covered by this chunk
        # int32 one-hot counts for this chunk only (cheap VPU compare+add).
        # S is small & static; the add chain keeps <= 1 mask live at a time
        # inside the bounded fori_loop body, so no vreg spills.
        counts_i = jnp.zeros((TB, vocab_chunk), jnp.int32)
        for s in range(S):
            counts_i = counts_i + (vocab_ids == idx[:, s][:, None]).astype(jnp.int32)
        counts = counts_i.astype(emb_ref.dtype)       # counts <= S: exact in bf16
        emb_chunk = emb_ref[pl.ds(base, vocab_chunk), :]
        return bag + jnp.dot(counts, emb_chunk,
                             preferred_element_type=jnp.float32)

    bag = lax.fori_loop(0, n_chunks, chunk_body,
                        jnp.zeros((TB, E), jnp.float32))       # (TB, E) f32

    # Linear -> ReLU -> (Dropout: identity at eval) -> Linear.  Biases stay f32.
    h = jnp.dot(bag.astype(w1_ref.dtype), w1_ref[...],
                preferred_element_type=jnp.float32) + b1_ref[...]
    h = jnp.maximum(h, 0.0)
    out = jnp.dot(h.astype(w2_ref.dtype), w2_ref[...],
                  preferred_element_type=jnp.float32) + b2_ref[...]
    out_ref[...] = out.astype(out_ref.dtype)


def _default_batch_tile(B):
    # 256-row tiles fill the 256-wide MXU on v6e/v7x but only once the batch is
    # big enough to still give >= 2 grid steps (both v7x TensorCores busy).
    # v5e's 128x128 MXU is equally served by 128-row tiles.
    if B >= 512:
        return 256
    if B >= 256:
        return 128
    return max(8, min(128, pl.cdiv(B, 8) * 8))


def bag_of_ngrams_forward(x, emb_tbl, w1, b1, w2, b2, *, tb=None,
                          param_dtype=jnp.bfloat16,
                          vmem_limit_bytes=32 * 1024 * 1024):
    B, S = x.shape
    V, E = emb_tbl.shape
    H = w1.shape[1]
    O = w2.shape[1]

    # bf16 weights by default (bf16-native MXUs on all three generations);
    # accumulation in the kernel stays f32.  Pass param_dtype=jnp.float32 for
    # a strict-tolerance path, or None to keep input dtypes untouched.
    if param_dtype is not None:
        emb_tbl = emb_tbl.astype(param_dtype)
        w1 = w1.astype(param_dtype)
        w2 = w2.astype(param_dtype)

    # Pad the vocab axis to a multiple of the 128-lane chunk; padded ids can
    # never match a real token (indices < V) so they contribute nothing.
    V_pad = pl.cdiv(V, VOCAB_CHUNK) * VOCAB_CHUNK
    if V_pad != V:
        emb_tbl = jnp.pad(emb_tbl, ((0, V_pad - V), (0, 0)))

    # Lane-dense output: pad output channels to a multiple of 128 so stores are
    # unmasked full-lane vst; slice the padding off after the call.
    O_pad = max(128, pl.cdiv(O, 128) * 128)
    if O_pad != O:
        w2 = jnp.pad(w2, ((0, 0), (0, O_pad - O)))
        b2 = jnp.pad(b2, ((0, 0), (0, O_pad - O)))

    # Batch tile; pad B up to a multiple of it.  Padded rows run the (cheap)
    # compute and are sliced off afterwards.
    if tb is None:
        tb = _default_batch_tile(B)
    tb = max(8, (min(tb, pl.cdiv(B, 8) * 8) // 8) * 8)
    B_pad = pl.cdiv(B, tb) * tb
    if B_pad != B:
        x = jnp.pad(x, ((0, B_pad - B), (0, 0)))

    kernel = functools.partial(bag_of_ngrams_kernel, vocab_chunk=VOCAB_CHUNK)

    out = pl.pallas_call(
        kernel,
        out_shape=jax.ShapeDtypeStruct((B_pad, O_pad), jnp.float32),
        grid_spec=pltpu.PrefetchScalarGridSpec(
            num_scalar_prefetch=0,
            grid=(B_pad // tb,),
            in_specs=[
                pl.BlockSpec((tb, S), lambda i: (i, 0)),        # indices tile
                pl.BlockSpec((V_pad, E), lambda i: (0, 0)),     # embedding table (resident)
                pl.BlockSpec((E, H), lambda i: (0, 0)),
                pl.BlockSpec((1, H), lambda i: (0, 0)),
                pl.BlockSpec((H, O_pad), lambda i: (0, 0)),
                pl.BlockSpec((1, O_pad), lambda i: (0, 0)),
            ],
            out_specs=pl.BlockSpec((tb, O_pad), lambda i: (i, 0)),
        ),
        compiler_params=pltpu.CompilerParams(
            dimension_semantics=("parallel",),
            vmem_limit_bytes=vmem_limit_bytes),
    )(x, emb_tbl, w1, b1, w2, b2)

    return out[:B, :O]


def xavier_uniform(key, fan_in, fan_out):
    bound = (6.0 / (fan_in + fan_out)) ** 0.5
    return jax.random.uniform(key, (fan_in, fan_out), jnp.float32, -bound, bound)


if __name__ == "__main__":
    # Small shapes consistent with the module (vocab, emb_dim, hidden, out).
    VOCAB, EMB, HID, OUT = 512, 128, 128, 64
    B, S = 256, 8            # default tile -> tb=128, grid of 2 steps (both v7x TCs)

    key = jax.random.PRNGKey(0)
    k_idx, k_emb, k_w1, k_b1, k_w2, k_b2 = jax.random.split(key, 6)

    # Deterministic parameter init (EmbeddingBag default ~ N(0,1); Linears xavier_uniform).
    x = jax.random.randint(k_idx, (B, S), 0, VOCAB, dtype=jnp.int32)
    emb_tbl = jax.random.normal(k_emb, (VOCAB, EMB), jnp.float32)
    w1 = xavier_uniform(k_w1, EMB, HID)
    b1 = jax.random.uniform(k_b1, (1, HID), jnp.float32,
                            -1.0 / EMB ** 0.5, 1.0 / EMB ** 0.5)
    w2 = xavier_uniform(k_w2, HID, OUT)
    b2 = jax.random.uniform(k_b2, (1, OUT), jnp.float32,
                            -1.0 / HID ** 0.5, 1.0 / HID ** 0.5)

    out = bag_of_ngrams_forward(x, emb_tbl, w1, b1, w2, b2)   # bf16 weights, f32 accum
    out = jax.block_until_ready(out)

    # Pure-JAX reference mirroring the kernel's bf16 weight quantization
    # (count/bag accumulation is f32 in both; only weight rounding differs).
    pe = jnp.bfloat16
    emb_q = emb_tbl.astype(pe).astype(jnp.float32)
    w1_q = w1.astype(pe).astype(jnp.float32)
    w2_q = w2.astype(pe).astype(jnp.float32)
    bag_ref = jnp.sum(emb_q[x], axis=1)
    h_ref = jnp.maximum(bag_ref.astype(pe).astype(jnp.float32) @ w1_q + b1, 0.0)
    ref = h_ref.astype(pe).astype(jnp.float32) @ w2_q + b2

    assert out.shape == (B, OUT)
    assert jnp.allclose(out, ref, atol=2e-2, rtol=2e-2)

    print("KERNEL_OK")
</pallas_src>

<mosaic_0001>
module attributes {stable_mosaic.version = 11 : i64} {
  func.func @bag_of_ngrams_kernel(%arg0: i32, %arg1: memref<128x8xi32, #tpu.memory_space<vmem>>, %arg2: memref<512x128xbf16, #tpu.memory_space<vmem>>, %arg3: memref<128x128xbf16, #tpu.memory_space<vmem>>, %arg4: memref<1x128xf32, #tpu.memory_space<vmem>>, %arg5: memref<128x128xbf16, #tpu.memory_space<vmem>>, %arg6: memref<1x128xf32, #tpu.memory_space<vmem>>, %arg7: memref<128x128xf32, #tpu.memory_space<vmem>>) attributes {dimension_semantics = [#tpu.dimension_semantics<parallel>], iteration_bounds = array<i64: 2>, scalar_prefetch = 0 : i64, scratch_operands = 0 : i64, tpu.core_type = #tpu.core_type<tc>, window_params = [{transform_indices = @transform_0, window_bounds = array<i64: 128, 8>}, {pipeline_mode = #tpu.pipeline_mode<synchronous>, transform_indices = @transform_1, window_bounds = array<i64: 512, 128>}, {pipeline_mode = #tpu.pipeline_mode<synchronous>, transform_indices = @transform_2, window_bounds = array<i64: 128, 128>}, {pipeline_mode = #tpu.pipeline_mode<synchronous>, transform_indices = @transform_3, window_bounds = array<i64: 1, 128>}, {pipeline_mode = #tpu.pipeline_mode<synchronous>, transform_indices = @transform_4, window_bounds = array<i64: 128, 128>}, {pipeline_mode = #tpu.pipeline_mode<synchronous>, transform_indices = @transform_5, window_bounds = array<i64: 1, 128>}, {transform_indices = @transform_6, window_bounds = array<i64: 128, 128>}]} {
    %c0 = arith.constant 0 : index
    %c0_0 = arith.constant 0 : index
    %0 = vector.load %arg1[%c0, %c0_0] : memref<128x8xi32, #tpu.memory_space<vmem>>, vector<128x8xi32>
    %1 = tpu.iota {dimensions = array<i32: 1>} : vector<128x128xi32>
    %cst = arith.constant 0.000000e+00 : f32
    %2 = vector.broadcast %cst : f32 to vector<128x128xf32>
    %c0_i32 = arith.constant 0 : i32
    %c4_i32 = arith.constant 4 : i32
    %3 = arith.addi %c0_i32, %c4_i32 : i32
    %c1_i32 = arith.constant 1 : i32
    %4 = scf.for %arg8 = %c0_i32 to %3 step %c1_i32 iter_args(%arg9 = %2) -> (vector<128x128xf32>)  : i32 {
      %c128_i32 = arith.constant 128 : i32
      %20 = arith.muli %arg8, %c128_i32 : i32
      %21 = tpu.assume_multiple %20, 128 : i32
      %22 = vector.broadcast %21 : i32 to vector<128x128xi32>
      %23 = arith.addi %1, %22 : vector<128x128xi32>
      %c0_i32_15 = arith.constant 0 : i32
      %24 = vector.broadcast %c0_i32_15 : i32 to vector<128x128xi32>
      %25 = vector.extract_strided_slice %0 {offsets = [0, 0], sizes = [128, 1], strides = [1, 1]} : vector<128x8xi32> to vector<128x1xi32>
      %26 = vector.shape_cast %25 : vector<128x1xi32> to vector<128xi32>
      %27 = vector.shape_cast %26 : vector<128xi32> to vector<128x1xi32>
      %28 = vector.broadcast %27 : vector<128x1xi32> to vector<128x128xi32>
      %29 = arith.cmpi eq, %23, %28 : vector<128x128xi32>
      %30 = arith.extui %29 : vector<128x128xi1> to vector<128x128xi32>
      %31 = arith.addi %24, %30 : vector<128x128xi32>
      %32 = vector.extract_strided_slice %0 {offsets = [0, 1], sizes = [128, 1], strides = [1, 1]} : vector<128x8xi32> to vector<128x1xi32>
      %33 = vector.shape_cast %32 : vector<128x1xi32> to vector<128xi32>
      %34 = vector.shape_cast %33 : vector<128xi32> to vector<128x1xi32>
      %35 = vector.broadcast %34 : vector<128x1xi32> to vector<128x128xi32>
      %36 = arith.cmpi eq, %23, %35 : vector<128x128xi32>
      %37 = arith.extui %36 : vector<128x128xi1> to vector<128x128xi32>
      %38 = arith.addi %31, %37 : vector<128x128xi32>
      %39 = vector.extract_strided_slice %0 {offsets = [0, 2], sizes = [128, 1], strides = [1, 1]} : vector<128x8xi32> to vector<128x1xi32>
      %40 = vector.shape_cast %39 : vector<128x1xi32> to vector<128xi32>
      %41 = vector.shape_cast %40 : vector<128xi32> to vector<128x1xi32>
      %42 = vector.broadcast %41 : vector<128x1xi32> to vector<128x128xi32>
      %43 = arith.cmpi eq, %23, %42 : vector<128x128xi32>
      %44 = arith.extui %43 : vector<128x128xi1> to vector<128x128xi32>
      %45 = arith.addi %38, %44 : vector<128x128xi32>
      %46 = vector.extract_strided_slice %0 {offsets = [0, 3], sizes = [128, 1], strides = [1, 1]} : vector<128x8xi32> to vector<128x1xi32>
      %47 = vector.shape_cast %46 : vector<128x1xi32> to vector<128xi32>
      %48 = vector.shape_cast %47 : vector<128xi32> to vector<128x1xi32>
      %49 = vector.broadcast %48 : vector<128x1xi32> to vector<128x128xi32>
      %50 = arith.cmpi eq, %23, %49 : vector<128x128xi32>
      %51 = arith.extui %50 : vector<128x128xi1> to vector<128x128xi32>
      %52 = arith.addi %45, %51 : vector<128x128xi32>
      %53 = vector.extract_strided_slice %0 {offsets = [0, 4], sizes = [128, 1], strides = [1, 1]} : vector<128x8xi32> to vector<128x1xi32>
      %54 = vector.shape_cast %53 : vector<128x1xi32> to vector<128xi32>
      %55 = vector.shape_cast %54 : vector<128xi32> to vector<128x1xi32>
      %56 = vector.broadcast %55 : vector<128x1xi32> to vector<128x128xi32>
      %57 = arith.cmpi eq, %23, %56 : vector<128x128xi32>
      %58 = arith.extui %57 : vector<128x128xi1> to vector<128x128xi32>
      %59 = arith.addi %52, %58 : vector<128x128xi32>
      %60 = vector.extract_strided_slice %0 {offsets = [0, 5], sizes = [128, 1], strides = [1, 1]} : vector<128x8xi32> to vector<128x1xi32>
      %61 = vector.shape_cast %60 : vector<128x1xi32> to vector<128xi32>
      %62 = vector.shape_cast %61 : vector<128xi32> to vector<128x1xi32>
      %63 = vector.broadcast %62 : vector<128x1xi32> to vector<128x128xi32>
      %64 = arith.cmpi eq, %23, %63 : vector<128x128xi32>
      %65 = arith.extui %64 : vector<128x128xi1> to vector<128x128xi32>
      %66 = arith.addi %59, %65 : vector<128x128xi32>
      %67 = vector.extract_strided_slice %0 {offsets = [0, 6], sizes = [128, 1], strides = [1, 1]} : vector<128x8xi32> to vector<128x1xi32>
      %68 = vector.shape_cast %67 : vector<128x1xi32> to vector<128xi32>
      %69 = vector.shape_cast %68 : vector<128xi32> to vector<128x1xi32>
      %70 = vector.broadcast %69 : vector<128x1xi32> to vector<128x128xi32>
      %71 = arith.cmpi eq, %23, %70 : vector<128x128xi32>
      %72 = arith.extui %71 : vector<128x128xi1> to vector<128x128xi32>
      %73 = arith.addi %66, %72 : vector<128x128xi32>
      %74 = vector.extract_strided_slice %0 {offsets = [0, 7], sizes = [128, 1], strides = [1, 1]} : vector<128x8xi32> to vector<128x1xi32>
      %75 = vector.shape_cast %74 : vector<128x1xi32> to vector<128xi32>
      %76 = vector.shape_cast %75 : vector<128xi32> to vector<128x1xi32>
      %77 = vector.broadcast %76 : vector<128x1xi32> to vector<128x128xi32>
      %78 = arith.cmpi eq, %23, %77 : vector<128x128xi32>
      %79 = arith.extui %78 : vector<128x128xi1> to vector<128x128xi32>
      %80 = arith.addi %73, %79 : vector<128x128xi32>
      %81 = arith.sitofp %80 : vector<128x128xi32> to vector<128x128xbf16>
      %82 = arith.index_cast %21 : i32 to index
      %c0_16 = arith.constant 0 : index
      %83 = vector.load %arg2[%82, %c0_16] : memref<512x128xbf16, #tpu.memory_space<vmem>>, vector<128x128xbf16>
      %cst_17 = arith.constant dense<0.000000e+00> : vector<128x128xf32>
      %84 = tpu.matmul %81, %83, %cst_17 {dimension_numbers = #tpu.dot_dimension_numbers<[1], [0], [0], [1], [0, 0, 1, 1], [], []>} : vector<128x128xbf16>, vector<128x128xbf16>, vector<128x128xf32> -> vector<128x128xf32>
      %85 = arith.addf %arg9, %84 : vector<128x128xf32>
      scf.yield %85 : vector<128x128xf32>
    }
    %c4_i32_1 = arith.constant 4 : i32
    %5 = arith.truncf %4 : vector<128x128xf32> to vector<128x128xbf16>
    %c0_2 = arith.constant 0 : index
    %c0_3 = arith.constant 0 : index
    %6 = vector.load %arg3[%c0_2, %c0_3] : memref<128x128xbf16, #tpu.memory_space<vmem>>, vector<128x128xbf16>
    %cst_4 = arith.constant dense<0.000000e+00> : vector<128x128xf32>
    %7 = tpu.matmul %5, %6, %cst_4 {dimension_numbers = #tpu.dot_dimension_numbers<[1], [0], [0], [1], [0, 0, 1, 1], [], []>} : vector<128x128xbf16>, vector<128x128xbf16>, vector<128x128xf32> -> vector<128x128xf32>
    %c0_5 = arith.constant 0 : index
    %c0_6 = arith.constant 0 : index
    %8 = vector.load %arg4[%c0_5, %c0_6] : memref<1x128xf32, #tpu.memory_space<vmem>>, vector<1x128xf32>
    %9 = vector.broadcast %8 : vector<1x128xf32> to vector<128x128xf32>
    %10 = arith.addf %7, %9 : vector<128x128xf32>
    %cst_7 = arith.constant 0.000000e+00 : f32
    %11 = vector.broadcast %cst_7 : f32 to vector<128x128xf32>
    %12 = arith.maximumf %10, %11 : vector<128x128xf32>
    %13 = arith.truncf %12 : vector<128x128xf32> to vector<128x128xbf16>
    %c0_8 = arith.constant 0 : index
    %c0_9 = arith.constant 0 : index
    %14 = vector.load %arg5[%c0_8, %c0_9] : memref<128x128xbf16, #tpu.memory_space<vmem>>, vector<128x128xbf16>
    %cst_10 = arith.constant dense<0.000000e+00> : vector<128x128xf32>
    %15 = tpu.matmul %13, %14, %cst_10 {dimension_numbers = #tpu.dot_dimension_numbers<[1], [0], [0], [1], [0, 0, 1, 1], [], []>} : vector<128x128xbf16>, vector<128x128xbf16>, vector<128x128xf32> -> vector<128x128xf32>
    %c0_11 = arith.constant 0 : index
    %c0_12 = arith.constant 0 : index
    %16 = vector.load %arg6[%c0_11, %c0_12] : memref<1x128xf32, #tpu.memory_space<vmem>>, vector<1x128xf32>
    %17 = vector.broadcast %16 : vector<1x128xf32> to vector<128x128xf32>
    %18 = arith.addf %15, %17 : vector<128x128xf32>
    %c0_13 = arith.constant 0 : index
    %c0_14 = arith.constant 0 : index
    %19 = vector.load %arg7[%c0_13, %c0_14] : memref<128x128xf32, #tpu.memory_space<vmem>>, vector<128x128xf32>
    tpu.vector_store %arg7[%c0_13, %c0_14], %18 {strides = array<i32>} : memref<128x128xf32, #tpu.memory_space<vmem>>, vector<128x128xf32>,
    return
  }
  func.func @transform_0(%arg0: i32) -> (i32, i32) {
    %c0_i32 = arith.constant 0 : i32
    %c0_i32_0 = arith.constant 0 : i32
    return %arg0, %c0_i32 : i32, i32
  }
  func.func @transform_1(%arg0: i32) -> (i32, i32) {
    %c0_i32 = arith.constant 0 : i32
    %c0_i32_0 = arith.constant 0 : i32
    %c0_i32_1 = arith.constant 0 : i32
    return %c0_i32, %c0_i32_0 : i32, i32
  }
  func.func @transform_2(%arg0: i32) -> (i32, i32) {
    %c0_i32 = arith.constant 0 : i32
    %c0_i32_0 = arith.constant 0 : i32
    %c0_i32_1 = arith.constant 0 : i32
    return %c0_i32, %c0_i32_0 : i32, i32
  }
  func.func @transform_3(%arg0: i32) -> (i32, i32) {
    %c0_i32 = arith.constant 0 : i32
    %c0_i32_0 = arith.constant 0 : i32
    %c0_i32_1 = arith.constant 0 : i32
    return %c0_i32, %c0_i32_0 : i32, i32
  }
  func.func @transform_4(%arg0: i32) -> (i32, i32) {
    %c0_i32 = arith.constant 0 : i32
    %c0_i32_0 = arith.constant 0 : i32
    %c0_i32_1 = arith.constant 0 : i32
    return %c0_i32, %c0_i32_0 : i32, i32
  }
  func.func @transform_5(%arg0: i32) -> (i32, i32) {
    %c0_i32 = arith.constant 0 : i32
    %c0_i32_0 = arith.constant 0 : i32
    %c0_i32_1 = arith.constant 0 : i32
    return %c0_i32, %c0_i32_0 : i32, i32
  }
  func.func @transform_6(%arg0: i32) -> (i32, i32) {
    %c0_i32 = arith.constant 0 : i32
    %c0_i32_0 = arith.constant 0 : i32
    return %arg0, %c0_i32 : i32, i32
  }
}

</mosaic_0001>

<bundles_post_ra>
// kernel: tpu_custom_call.1
= control target key start
LH: loop header
LB: loop body
LE: loop exit
PB: predicated region body
PF: predicated region fallthrough
CT: control target
= control target key end

     0   :  { %11 = vsyncpa [#allocation3], 0  ;;  %s3802_s0 = inlined_call_operand.vmem [shape: s32[256,8], index: 0, kind: input, shape index: {}]   ;;  %s3803_s1 = inlined_call_operand.vmem [shape: bf16[512,128], index: 1, kind: input, shape index: {}]   ;;  %s3804_s2 = inlined_call_operand.hbm [shape: bf16[128,128], index: 2, kind: input, shape index: {}]   ;;  %s3805_s3 = inlined_call_operand.vmem [shape: f32[1,128], index: 3, kind: input, shape index: {}]   ;;  %s3806_s4 = inlined_call_operand.hbm [shape: bf16[128,128], index: 4, kind: input, shape index: {}]   ;;  %s3807_s5 = inlined_call_operand.vmem [shape: f32[1,128], index: 5, kind: input, shape index: {}]   ;;  %s3808_s6 = inlined_call_operand.hbm [shape: f32[256,128], index: 6, kind: output, shape index: {}]  }
   0x1   :  { %12 = vsyncpa [#allocation6], 0 }
   0x2   :  { %13 = vsyncpa [#allocation4], 0 }
   0x3   :  { %15 = vsyncpa [#allocation4 + $0x1], 0  ;;  %s2595_s21 = smov 0   ;;  %s2597_s22 = smov 0  }
   0x4   :  { %s2599_s23 = smov 0   ;;  %s2601_s24 = smov 0  }
   0x5 LB: > { %s2616_s25 = sadd.s32 4294967295, %s2475_s24   ;;  %s1821_s26 = sadd.s32 4294967294, %s2475_s24   ;;  %s2475_s24 = sphi %s2601_s24, %s3929_s24   ;;  %s2471_s23 = sphi %s2599_s23, %s3928_s23   ;;  %s2467_s22 = sphi %s2597_s22, %s3927_s22   ;;  %s2463_s21 = sphi %s2595_s21, %s3926_s21  }
   0x6   : > { %s2620_s27 = sadd.s32 1, %s2475_s24   ;;  %s159_s28 = sadd.s32 1, %s2471_s23 }
   0x7   : > { %s156_s29 = ssub.s32 %s2475_s24, %s2620_s27  ;;  %p169_p0 = scmp.ne.s32.totalorder %s2471_s23, %s2467_s22 }
   0x8   : > { %p157_p1 = scmp.eq.s32.totalorder %s156_s29, 0  ;;  %p170_p2 = scmp.eq.s32.totalorder %s2616_s25, 1 }
   0x9   : > { %p175_p3 = scmp.ne.s32.totalorder %s2467_s22, %s2463_s21  ;;  %p176_p4 = scmp.eq.s32.totalorder %s1821_s26, 1 }
   0xa   : > { %s2631_s30 = scalar_select %p157_p1, %s2471_s23, %s159_s28  }
   0xb   : > { %p2633_p5 = por %p170_p2, %p169_p0  ;;  %p2637_p6 = por %p176_p4, %p175_p3 }
   0xc   : > { %p1822_p7 = scmp.ge.s32.totalorder %s2475_s24, 1  ;;  %p183_p8 = scmp.lt.s32.totalorder %s2475_s24, 3 }
   0xd   : > { %s3828_s7 = scalar_select %p2633_p5, 1, 0 }
   0xe   : > { %s3829_s8 = scalar_select %p2637_p6, 1, 0 }
   0xf   : > { %p3809_p9 = scmp.eq.s32.totalorder %s2616_s25, 0  ;;  %p2644_p10 = pnand %p1822_p7, %p183_p8 }
  0x10   : > { %s2545_s10 = smov [#allocation2]   ;;  %s2546_s13 = smov [#allocation5]  }
  0x11   : > { %s3830_s9 = scalar_select %p2644_p10, 1, 0 }
  0x12   : > { %s198_s11 = sshll.u32 %s2545_s10, 4  ;;  %p2036_p11 = pneg %p2644_p10  ;;  %s199_s11 = int_to_ptr.vmem [resolvable:$true] %s198_s11 }
  0x13   : > { %s214_s14 = sshll.u32 %s2546_s13, 4  ;;  %s2281_s17 = scalar_lea.hbm %s3804_s2, 1024  ;;  %s2656_s14 = int_to_ptr.vmem [resolvable:$true] %s214_s14 }
  0x14   : > { %p2652_p12 = pnand %p3809_p9, %p2036_p11  ;;  %p2282_p13 = scmp.ne.s32.totalorder %s3804_s2, %s2281_s17 }
  0x15   : > { %p2288_p3 = scmp.lt.u32.totalorder %s2281_s17, %s3804_s2 }
  0x16   : > { %p2283_p0 = pneg %p2652_p12 }
  0x18   : > { %p2284_p1 = pnand %p2283_p0, %p2282_p13 }
  0x1a   : > { %p2285_p2 = pneg %p2284_p1 }
  0x1c   : > { %p2290_p4 = pnand %p2288_p3, %p2285_p2 }
  0x1e   : > { %2293 = shalt.err (!%p2290_p4)
}
  0x1f   : > { %s2294_s28 = scalar_lea.vmem %s199_s11, 1024  ;;  %p2302_p9 = scmp.lt.s32.totalorder %s199_s11, %s199_s11 }
  0x20   : > { %p2295_p7 = scmp.ne.s32.totalorder %s199_s11, %s2294_s28  ;;  %p2303_p6 = scmp.lt.s32.totalorder %s2294_s28, %s2294_s28 }
  0x22   : > { %p2297_p8 = pnand %p2295_p7, %p2283_p0  ;;  %p2304_p5 = por %p2303_p6, %p2302_p9 }
  0x24   : > { %p2298_p11 = pneg %p2297_p8 }
  0x26   : > { %p2305_p10 = pnand %p2304_p5, %p2298_p11 }
  0x28   : > { %2308 = shalt.err (!%p2305_p10)
}
  0x29   : > { %s2547_s29 = smov 64   ;;  %s2548_s10 = smov 4  }
  0x2a   : > { %2039 = dma.hbm_to_vmem [thread:$0]  (!%p2652_p12), %s3804_s2, 1024, %s199_s11, [#allocation3], %s2547_s29, %s2547_s29, %s2548_s10  }
  0x2b   : > { %s2309_s18 = scalar_lea.hbm %s3806_s4, 1024 }
  0x2c   : > { %p2310_p13 = scmp.ne.s32.totalorder %s3806_s4, %s2309_s18  ;;  %p2316_p9 = scmp.lt.u32.totalorder %s2309_s18, %s3806_s4 }
  0x2e   : > { %p2312_p5 = pnand %p2310_p13, %p2283_p0 }
  0x30   : > { %p2313_p6 = pneg %p2312_p5 }
  0x32   : > { %p2318_p10 = pnand %p2316_p9, %p2313_p6 }
  0x34   : > { %2321 = shalt.err (!%p2318_p10)
}
  0x35   : > { %s2322_s11 = scalar_lea.vmem %s2656_s14, 1024  ;;  %p2330_p4 = scmp.lt.s32.totalorder %s2656_s14, %s2656_s14 }
  0x36   : > { %p2323_p1 = scmp.ne.s32.totalorder %s2656_s14, %s2322_s11  ;;  %p2331_p7 = scmp.lt.s32.totalorder %s2322_s11, %s2322_s11 }
  0x38   : > { %p2325_p2 = pnand %p2323_p1, %p2283_p0  ;;  %p2332_p8 = por %p2331_p7, %p2330_p4 }
  0x3a   : > { %p2326_p3 = pneg %p2325_p2 }
  0x3c   : > { %p2333_p11 = pnand %p2332_p8, %p2326_p3 }
  0x3e   : > { %2336 = shalt.err (!%p2333_p11)
}
  0x3f   : > { %2042 = dma.hbm_to_vmem [thread:$0]  (!%p2652_p12), %s3806_s4, 1024, %s2656_s14, [#allocation6], %s2547_s29, %s2547_s29, %s2548_s10  }
  0x40   : > { %p3832_p13 = scmp.ne.s32.totalorder %s3830_s9, 0 }
  0x42   : > { %242 = sbr.rel (%p3832_p13) target bundleno = 1213 (0x4bd), region = 44 }
  0x49   : > { %p3833_p5 = scmp.eq.s32.totalorder %s2616_s25, 0 }
  0x4b   : > { %2450 = dma.done.wait (%p3833_p5), [#allocation3], 1024   ;;  %p3834_p0 = pmov %p3833_p5 }
  0x4d   : > { %2452 = vsyncadd (%p3834_p0), [#allocation3], 4294966272  ;;  %p3835_p6 = pmov %p3834_p0 }
  0x4e   : > { %p3836_p9 = pmov %p3834_p0 }
  0x4f   : > { %2454 = dma.done.wait (%p3835_p6), [#allocation6], 1024  }
  0x50   : > { %2456 = vsyncadd (%p3836_p9), [#allocation6], 4294966272  ;;  %s1830_s12 = sshll.u32 %s2616_s25, 4  ;;  %s273_s14 = sand.u32 1, %s2467_s22   ;;  %v300_v0 = vlaneseq  ;;  %v2758_v18 = vmov 0.0   ;;  %v2760_v19 = vmov 0.0  }
  0x51   : > { %p277_p12 = scmp.lt.s32.totalorder %s1830_s12, 31  ;;  %s1829_s9 = sshll.u32 %s273_s14, 7  ;;  %v2762_v20 = vmov 0.0   ;;  %v2764_v21 = vmov 0.0   ;;  %v2766_v22 = vmov 0.0   ;;  %v2768_v23 = vmov 0.0  }
  0x52   : > { %v2719_v1 = vand.u32 127, %v300_v0  ;;  %s2756_s18 = scalar_lea.vmem [#allocation7], %s1829_s9  ;;  %v2770_v24 = vmov 0.0   ;;  %v2772_v25 = vmov 0.0   ;;  %v2774_v26 = vmov 0.0   ;;  %s2790_s19 = smov 0  }
  0x53   : > { %s3931_s12 = smov (!%p277_p12, %s1830_s12), 31  ;;  %v2776_v27 = vmov 0.0   ;;  %v2778_v28 = vmov 0.0   ;;  %v2780_v29 = vmov 0.0   ;;  %v2782_v30 = vmov 0.0  }
  0x54   : > { %3837 = vst [vmem:[#allocation11_spill] sm:$0xff] %v2719_v1  ;;  %s1831_s29 = sshll.u32 %s3931_s12, 3  ;;  %v2784_v31 = vmov 0.0   ;;  %v2786_v32 = vmov 0.0   ;;  %v2788_v33 = vmov 0.0  }
  0x55   : > { %s280_s17 = scalar_lea.vmem %s3802_s0, %s1831_s29 }
  0x56   : > { %v2724_v2 = vld [vmem:[%s280_s17] sm:$0xff]  ;;  %v2726_v3 = vld [vmem:[%s280_s17 + $0x8] sm:$0xff]  ;;  %v2728_v4 = vld [vmem:[%s280_s17 + $0x10] sm:$0xff] }
  0x57   : > { %3838 = vst [vmem:[#allocation12_spill] sm:$0xff] %v2724_v2  ;;  %3839 = vst [vmem:[#allocation13_spill] sm:$0xff] %v2726_v3  ;;  %v2730_v5 = vld [vmem:[%s280_s17 + $0x18] sm:$0xff]  ;;  %v2732_v6 = vld [vmem:[%s280_s17 + $0x20] sm:$0xff] }
  0x58   : > { %3840 = vst [vmem:[#allocation14_spill] sm:$0xff] %v2728_v4  ;;  %3841 = vst [vmem:[#allocation15_spill] sm:$0xff] %v2730_v5  ;;  %v2734_v7 = vld [vmem:[%s280_s17 + $0x28] sm:$0xff]  ;;  %v2736_v8 = vld [vmem:[%s280_s17 + $0x30] sm:$0xff] }
  0x59   : > { %v2738_v9 = vld [vmem:[%s280_s17 + $0x38] sm:$0xff]  ;;  %v2740_v10 = vld [vmem:[%s280_s17 + $0x40] sm:$0xff]  ;;  %v2742_v11 = vld [vmem:[%s280_s17 + $0x48] sm:$0xff] }
  0x5a   : > { %3842 = vst [vmem:[#allocation16_spill] sm:$0xff] %v2740_v10  ;;  %3843 = vst [vmem:[#allocation17_spill] sm:$0xff] %v2742_v11  ;;  %v2744_v12 = vld [vmem:[%s280_s17 + $0x50] sm:$0xff]  ;;  %v2746_v13 = vld [vmem:[%s280_s17 + $0x58] sm:$0xff] }
  0x5b   : > { %3844 = vst [vmem:[#allocation18_spill] sm:$0xff] %v2744_v12  ;;  %v2748_v14 = vld [vmem:[%s280_s17 + $0x60] sm:$0xff]  ;;  %v2750_v15 = vld [vmem:[%s280_s17 + $0x68] sm:$0xff]  ;;  %v2752_v16 = vld [vmem:[%s280_s17 + $0x70] sm:$0xff] }
  0x5c   : > { %v2754_v17 = vld [vmem:[%s280_s17 + $0x78] sm:$0xff] }
  0x5d LB: >> { %3852 = vst [vmem:[#allocation19_spill] sm:$0xff] %v2479_v18  ;;  %3853 = vst [vmem:[#allocation20_spill] sm:$0xff] %v2483_v19  ;;  %v3814_v34 = vmov 0   ;;  %v2550_v35 = vmov 1   ;;  %v2551_v36 = vmov 2   ;;  %v3818_v37 = vmov 3   ;;  %v2503_v24 = vphi %v2770_v24, %v3914_v24   ;;  %v2499_v23 = vphi %v2768_v23, %v3913_v23   ;;  %v2495_v22 = vphi %v2766_v22, %v3912_v22   ;;  %v2491_v21 = vphi %v2764_v21, %v3911_v21   ;;  %v2487_v20 = vphi %v2762_v20, %v3910_v20   ;;  %v2483_v19 = vphi %v2760_v19, %v3909_v19   ;;  %v2479_v18 = vphi %v2758_v18, %v3908_v18   ;;  %s2543_s19 = sphi %s2790_s19, %s307_s19   ;;  %v2539_v33 = vphi %v2788_v33, %v3923_v33   ;;  %v2535_v32 = vphi %v2786_v32, %v3922_v32   ;;  %v2531_v31 = vphi %v2784_v31, %v3921_v31   ;;  %v2527_v30 = vphi %v2782_v30, %v3920_v30   ;;  %v2523_v29 = vphi %v2780_v29, %v3919_v29   ;;  %v2519_v28 = vphi %v2778_v28, %v3918_v28   ;;  %v2515_v27 = vphi %v2776_v27, %v3917_v27   ;;  %v2511_v26 = vphi %v2774_v26, %v3916_v26   ;;  %v2507_v25 = vphi %v2772_v25, %v3915_v25  }
  0x5e   : >> { %v3847_v3 = vld [vmem:[#allocation13_spill] sm:$0xff]  ;;  %v3851_v2 = vld [vmem:[#allocation12_spill] sm:$0xff]  ;;  %3854 = vst [vmem:[#allocation21_spill] sm:$0xff] %v2487_v20  ;;  %3855 = vst [vmem:[#allocation22_spill] sm:$0xff] %v2491_v21  ;;  %2235 = vset.pattern.permute.xlu1 %v3814_v34  ;;  %2234 = vset.pattern.permute.xlu0 %v3814_v34  ;;  %v3813_v38 = vmov 4   ;;  %v3812_v47 = vmov 5  }
  0x5f   : >> { %v3845_v5 = vld [vmem:[#allocation15_spill] sm:$0xff]  ;;  %v3848_v4 = vld [vmem:[#allocation14_spill] sm:$0xff]  ;;  %3856 = vst [vmem:[#allocation23_spill] sm:$0xff] %v2495_v22  ;;  %3857 = vst [vmem:[#allocation24_spill] sm:$0xff] %v2499_v23  ;;  %328 = vperm.xlu0 %2234, %v3851_v2   ;;  %v3816_v56 = vmov 6   ;;  %v3868_v20 = vmov 6  }
  0x60   : >> { %3858 = vst [vmem:[#allocation25_spill] sm:$0xff] %v2503_v24  ;;  %3859 = vst [vmem:[#allocation26_spill] sm:$0xff] %v2507_v25  ;;  %334 = vperm.xlu1 %2235, %v3848_v4   ;;  %s1832_s20 = sshll.u32 %s2543_s19, 7  ;;  %v3871_v22 = vmov 7   ;;  %v3872_v1 = vld [vmem:[#allocation11_spill] sm:$0xff]  ;;  %s307_s19 = sadd.s32 1, %s2543_s19  }
  0x61   : >> { %v3849_v11 = vld [vmem:[#allocation17_spill] sm:$0xff]  ;;  %v3850_v10 = vld [vmem:[#allocation16_spill] sm:$0xff]  ;;  %3860 = vst [vmem:[#allocation27_spill] sm:$0xff] %v2511_v26  ;;  %3861 = vst [vmem:[#allocation28_spill] sm:$0xff] %v2515_v27  ;;  %s1103_s26 = sshra.s32 %s1832_s20, 3  ;;  %v325_v24 = vstv %s1832_s20  ;;  %p3660_p10 = scmp.ge.s32.totalorder %s307_s19, 4  }
  0x62   : >> { %v3846_v12 = vld [vmem:[#allocation18_spill] sm:$0xff]  ;;  %3862 = vst [vmem:[#allocation29_spill] sm:$0xff] %v2519_v28  ;;  %3863 = vst [vmem:[#allocation30_spill] sm:$0xff] %v2523_v29  ;;  %s1833_s28 = sshll.u32 %s1103_s26, 2  ;;  %v3058_v25 = vadd.s32 %v325_v24, %v3872_v1  ;;  %s1865_s17 = sshll.u32 (%p3660_p10), %s2616_s25, 11 }
  0x63   : >> { %3864 = vst [vmem:[#allocation31_spill] sm:$0xff] %v2527_v30  ;;  %3865 = vst [vmem:[#allocation32_spill] sm:$0xff] %v2531_v31  ;;  %331 = vperm.xlu0 %2234, %v3847_v3   ;;  %s3018_s15 = scalar_lea.vmem %s3803_s1, %s1833_s28  ;;  %s1682_s19 = sshll.u32 (%p3660_p10), %s2756_s18, 4  ;;  %s3754_s19 = int_to_ptr.vmem [resolvable:$true] %s1682_s19 }
  0x64   : >> { %3866 = vst [vmem:[#allocation33_spill] sm:$0xff] %v2535_v32  ;;  %3867 = vst [vmem:[#allocation34_spill] sm:$0xff] %v2539_v33  ;;  %337 = vperm.xlu1 %2235, %v3845_v5   ;;  %v2258_v28 = vld [vmem:[%s3018_s15 + $0x8] sm:$0xff]   ;;  %v2259_v27 = vld [vmem:[%s3018_s15 + $0x10] sm:$0xff]   ;;  %s3752_s28 = scalar_lea.hbm (%p3660_p10), %s3808_s6, %s1865_s17  ;;  %s3761_s25 = scalar_lea.sflag (%p3660_p10), [#allocation4], %s273_s14 }
  0x65   : >> { %v2260_v32 = vld [vmem:[%s3018_s15 + $0x18] sm:$0xff]   ;;  %v2261_v30 = vld [vmem:[%s3018_s15 + $0x20] sm:$0xff]   ;;  %s2337_s11 = scalar_lea.vmem (%p3660_p10), %s3754_s19, 2048  ;;  %p3924_p2 = scmp.ne.s32.totalorder (%p3660_p10), %s3828_s7, 0 }
  0x66   : > { %p2338_p1 = scmp.ne.s32.totalorder (%p3660_p10), %s3754_s19, %s2337_s11  ;;  %s2557_s13 = smov (%p3660_p10), [#allocation7]  }
  0x67   : >> { %340 = vperm.xlu0 %2234, %v2732_v6  }
  0x68   : >> { %343 = vperm.xlu1 %2235, %v2734_v7   ;;  %p2339_p3 = pnand (%p3660_p10), %p2338_p1, %p3924_p2 }
  0x6a   : > { %p2340_p4 = pneg (%p3660_p10), %p2339_p3 }
  0x6b   : >> { %346 = vperm.xlu0 %2234, %v2736_v8  }
  0x6c   : >> { %349 = vperm.xlu1 %2235, %v2738_v9  }
  0x6f   : >> { %352 = vperm.xlu0 %2234, %v3850_v10  }
  0x70   : >> { %355 = vperm.xlu1 %2235, %v3849_v11  }
  0x73   : >> { %358 = vperm.xlu0 %2234, %v3846_v12  }
  0x74   : >> { %361 = vperm.xlu1 %2235, %v2746_v13  }
  0x77   : >> { %364 = vperm.xlu0 %2234, %v2748_v14  }
  0x78   : >> { %367 = vperm.xlu1 %2235, %v2750_v15  }
  0x7b   : >> { %370 = vperm.xlu0 %2234, %v2752_v16  }
  0x7c   : >> { %373 = vperm.xlu1 %2235, %v2754_v17  }
  0x7f   : >> { %2236 = vset.pattern.permute.xlu0 %v2550_v35 }
  0x80   : >> { %2237 = vset.pattern.permute.xlu1 %v2550_v35  ;;  %408 = vperm.xlu0 %2236, %v3851_v2  }
  0x81   : >> { %411 = vperm.xlu1 %2237, %v3847_v3  }
  0x84   : >> { %417 = vperm.xlu0 %2236, %v3845_v5  }
  0x85   : >> { %414 = vperm.xlu1 %2237, %v3848_v4  }
  0x88   : >> { %423 = vperm.xlu0 %2236, %v2734_v7  }
  0x89   : >> { %420 = vperm.xlu1 %2237, %v2732_v6  }
  0x8c   : >> { %429 = vperm.xlu0 %2236, %v2738_v9  }
  0x8d   : >> { %426 = vperm.xlu1 %2237, %v2736_v8  }
  0x90   : >> { %435 = vperm.xlu0 %2236, %v3849_v11  }
  0x91   : >> { %432 = vperm.xlu1 %2237, %v3850_v10  }
  0x94   : >> { %441 = vperm.xlu0 %2236, %v2746_v13  }
  0x95   : >> { %438 = vperm.xlu1 %2237, %v3846_v12  }
  0x98   : >> { %447 = vperm.xlu0 %2236, %v2750_v15  }
  0x99   : >> { %444 = vperm.xlu1 %2237, %v2748_v14  }
  0x9c   : >> { %453 = vperm.xlu0 %2236, %v2754_v17  }
  0x9d   : >> { %450 = vperm.xlu1 %2237, %v2752_v16  }
  0xa0   : >> { %2239 = vset.pattern.permute.xlu0 %v2551_v36 }
  0xa1   : >> { %2238 = vset.pattern.permute.xlu1 %v2551_v36  ;;  %507 = vperm.xlu0 %2239, %v3847_v3  }
  0xa2   : >> { %504 = vperm.xlu1 %2238, %v3851_v2  }
  0xa5   : >> { %516 = vperm.xlu0 %2239, %v2732_v6  }
  0xa6   : >> { %510 = vperm.xlu1 %2238, %v3848_v4  }
  0xa9   : >> { %522 = vperm.xlu0 %2239, %v2736_v8  }
  0xaa   : >> { %513 = vperm.xlu1 %2238, %v3845_v5  }
  0xad   : >> { %528 = vperm.xlu0 %2239, %v3850_v10  }
  0xae   : >> { %519 = vperm.xlu1 %2238, %v2734_v7  }
  0xb1   : >> { %534 = vperm.xlu0 %2239, %v3846_v12  }
  0xb2   : >> { %525 = vperm.xlu1 %2238, %v2738_v9  }
  0xb5   : >> { %540 = vperm.xlu0 %2239, %v2748_v14  }
  0xb6   : >> { %531 = vperm.xlu1 %2238, %v3849_v11  }
  0xb9   : >> { %546 = vperm.xlu0 %2239, %v2752_v16  }
  0xba   : >> { %537 = vperm.xlu1 %2238, %v2746_v13  }
  0xbd   : >> { %2240 = vset.pattern.permute.xlu0 %v3818_v37 }
  0xbe   : >> { %543 = vperm.xlu1 %2238, %v2750_v15   ;;  %600 = vperm.xlu0 %2240, %v3851_v2  }
  0xc2   : >> { %549 = vperm.xlu1 %2238, %v2754_v17   ;;  %609 = vperm.xlu0 %2240, %v3845_v5  }
  0xc6   : >> { %2241 = vset.pattern.permute.xlu1 %v3818_v37  ;;  %627 = vperm.xlu0 %2240, %v3849_v11  }
  0xc7   : >> { %603 = vperm.xlu1 %2241, %v3847_v3  }
  0xca   : >> { %633 = vperm.xlu0 %2240, %v2746_v13  }
  0xcb   : >> { %606 = vperm.xlu1 %2241, %v3848_v4  }
  0xce   : >> { %612 = vperm.xlu0 %2240, %v2732_v6  }
  0xcf   : >> { %624 = vperm.xlu1 %2241, %v3850_v10  }
  0xd2   : >> { %639 = vperm.xlu0 %2240, %v2750_v15  }
  0xd3   : >> { %630 = vperm.xlu1 %2241, %v3846_v12  }
  0xd6   : >> { %618 = vperm.xlu0 %2240, %v2736_v8  }
  0xd7   : >> { %2242 = vset.pattern.permute.xlu1 %v3813_v38 }
  0xd8   : >> { %696 = vperm.xlu1 %2242, %v3851_v2  }
  0xda   : >> { %645 = vperm.xlu0 %2240, %v2754_v17  }
  0xdc   : >> { %720 = vperm.xlu1 %2242, %v3850_v10  }
  0xde   : >> { %2248 = vset.pattern.permute.xlu0 %v3813_v38  ;;  %v2913_v40 = vpop.permute.xlu0 %328 }
  0xdf   : >> { %v2910_v39 = vpop.permute.xlu1 %334  ;;  %699 = vperm.xlu0 %2248, %v3847_v3   ;;  %vm375_vm1 = vcmp.eq.s32.totalorder %v3058_v25, %v2913_v40 }
  0xe0   : >> { %723 = vperm.xlu1 %2242, %v3849_v11  }
  0xe2   : >> { %v2919_v42 = vpop.permute.xlu0 %331 }
  0xe3   : >> { %v2917_v41 = vpop.permute.xlu1 %337  ;;  %702 = vperm.xlu0 %2248, %v3848_v4   ;;  %vm376_vm5 = vcmp.eq.s32.totalorder %v3058_v25, %v2919_v42 }
  0xe4   : >> { %705 = vperm.xlu1 %2242, %v3845_v5   ;;  %vm378_vm3 = vcmp.eq.s32.totalorder %v3058_v25, %v2917_v41  ;;  %v2263_v41 = vld [vmem:[%s3018_s15 + $0x30] sm:$0xff]  }
  0xe6   : >> { %v2925_v44 = vpop.permute.xlu0 %340 }
  0xe7   : >> { %v2923_v43 = vpop.permute.xlu1 %343  ;;  %726 = vperm.xlu0 %2248, %v3846_v12  }
  0xe8   : >> { %729 = vperm.xlu1 %2242, %v2746_v13  }
  0xea   : >> { %v2931_v46 = vpop.permute.xlu0 %346 }
  0xeb   : >> { %v2929_v45 = vpop.permute.xlu1 %349  ;;  %708 = vperm.xlu0 %2248, %v2732_v6  }
  0xec   : >> { %2243 = vset.pattern.permute.xlu1 %v3812_v47 }
  0xed   : >> { %795 = vperm.xlu1 %2243, %v3847_v3  }
  0xee   : >> { %v2938_v49 = vpop.permute.xlu0 %352 }
  0xef   : >> { %v2936_v48 = vpop.permute.xlu1 %355  ;;  %735 = vperm.xlu0 %2248, %v2750_v15  }
  0xf0   : >> { %vm384_vm12 = vcmp.eq.s32.totalorder %v3058_v25, %v2936_v48 }
  0xf1   : >> { %816 = vperm.xlu1 %2243, %v3850_v10  }
  0xf2   : >> { %v2944_v51 = vpop.permute.xlu0 %358 }
  0xf3   : >> { %v2942_v50 = vpop.permute.xlu1 %361  ;;  %717 = vperm.xlu0 %2248, %v2738_v9  }
  0xf4   : >> { %vm386_vm4 = vcmp.eq.s32.totalorder %v3058_v25, %v2942_v50 }
  0xf5   : >> { %798 = vperm.xlu1 %2243, %v3848_v4  }
  0xf6   : >> { %v2950_v53 = vpop.permute.xlu0 %364 }
  0xf7   : >> { %v2948_v52 = vpop.permute.xlu1 %367  ;;  %741 = vperm.xlu0 %2248, %v2754_v17  }
  0xf8   : >> { %vm388_vm7 = vcmp.eq.s32.totalorder %v3058_v25, %v2948_v52 }
  0xf9   : >> { %822 = vperm.xlu1 %2243, %v3846_v12  }
  0xfa   : >> { %v2956_v55 = vpop.permute.xlu0 %370 }
  0xfb   : >> { %v2954_v54 = vpop.permute.xlu1 %373  ;;  %2251 = vset.pattern.permute.xlu0 %v3812_v47 }
  0xfc   : >> { %792 = vperm.xlu0 %2251, %v3851_v2   ;;  %vm390_vm9 = vcmp.eq.s32.totalorder %v3058_v25, %v2954_v54  ;;  %v3874_v54 = vmov 4  }
  0xfd   : >> { %2244 = vset.pattern.permute.xlu1 %v3816_v56 }
  0xfe   : >> { %888 = vperm.xlu1 %2244, %v3851_v2  }
  0xff   : >> { %v2964_v58 = vpop.permute.xlu0 %408 }
 0x100   : >> { %v2962_v57 = vpop.permute.xlu1 %411  ;;  %819 = vperm.xlu0 %2251, %v3849_v11   ;;  %vm455_vm2 = vcmp.eq.s32.totalorder %v3058_v25, %v2964_v58 }
 0x101   : >> { %vm456_vm14 = vcmp.eq.s32.totalorder %v3058_v25, %v2962_v57 }
 0x102   : >> { %912 = vperm.xlu1 %2244, %v3850_v10  }
 0x103   : >> { %v2970_v60 = vpop.permute.xlu0 %417 }
 0x104   : >> { %v2968_v59 = vpop.permute.xlu1 %414  ;;  %801 = vperm.xlu0 %2251, %v3845_v5   ;;  %vm458_vm11 = vcmp.eq.s32.totalorder %v3058_v25, %v2970_v60 }
 0x106   : >> { %915 = vperm.xlu1 %2244, %v3849_v11  }
 0x107   : >> { %v2976_v62 = vpop.permute.xlu0 %423 }
 0x108   : >> { %v2974_v61 = vpop.permute.xlu1 %420  ;;  %825 = vperm.xlu0 %2251, %v2746_v13  }
 0x10a   : >> { %897 = vperm.xlu1 %2244, %v3845_v5  }
 0x10b   : >> { %v2982_v0 = vpop.permute.xlu0 %429 }
 0x10c   : >> { %v2980_v63 = vpop.permute.xlu1 %426  ;;  %807 = vperm.xlu0 %2251, %v2734_v7  }
 0x10e   : >> { %921 = vperm.xlu1 %2244, %v2746_v13  }
 0x10f   : >> { %v2988_v36 = vpop.permute.xlu0 %435 }
 0x110   : >> { %v2986_v35 = vpop.permute.xlu1 %432  ;;  %810 = vperm.xlu0 %2251, %v2736_v8  }
 0x112   : >> { %2245 = vset.pattern.permute.xlu1 %v3818_v37  ;;  %v3819_v37 = vmov 7  }
 0x113   : >> { %615 = vperm.xlu1 %2245, %v2734_v7   ;;  %v2995_v38 = vpop.permute.xlu0 %441 }
 0x114   : >> { %v2993_v47 = vpop.permute.xlu1 %438  ;;  %834 = vperm.xlu0 %2251, %v2752_v16   ;;  %vm466_vm0 = vcmp.eq.s32.totalorder %v3058_v25, %v2995_v38 }
 0x117   : >> { %636 = vperm.xlu1 %2245, %v2748_v14   ;;  %v3001_v56 = vpop.permute.xlu0 %447 }
 0x118   : >> { %v2999_v34 = vpop.permute.xlu1 %444  ;;  %2253 = vset.pattern.permute.xlu0 %v3868_v20  ;;  %vm468_vm6 = vcmp.eq.s32.totalorder %v3058_v25, %v3001_v56  ;;  %v2264_v56 = vld [vmem:[%s3018_s15 + $0x38] sm:$0xff]  }
 0x119   : >> { %891 = vperm.xlu0 %2253, %v3847_v3  }
 0x11b   : >> { %2246 = vset.pattern.permute.xlu1 %v3819_v37  ;;  %v3010_v21 = vpop.permute.xlu0 %453  ;;  %v2257_v37 = vld [vmem:[%s3018_s15] sm:$0xff]  }
 0x11c   : >> { %984 = vperm.xlu1 %2246, %v3851_v2   ;;  %v3008_v18 = vpop.permute.xlu1 %450  ;;  %2010 = vmatprep.subr.bf16.mxu1 %v2257_v37  ;;  %vm470_vm13 = vcmp.eq.s32.totalorder %v3058_v25, %v3010_v21 }
 0x11d   : >> { %3869 = vst [vmem:[#allocation35_spill] sm:$0xff] %v3008_v18  ;;  %894 = vperm.xlu0 %2253, %v3848_v4   ;;  %1914 = vmatprep.subr.bf16.mxu0 %v2257_v37 }
 0x11e   : >> { %2018 = vmatpush3.bf16.msra.mxu1 %v2257_v37  ;;  %1915 = vmatpush3.bf16.msra.mxu0 %v2257_v37 }
 0x11f   : >> { %2011 = vmatprep.subr.bf16.mxu1 %v2258_v28  ;;  %1916 = vmatprep.subr.bf16.mxu0 %v2258_v28 }
 0x120   : >> { %1008 = vperm.xlu1 %2246, %v3850_v10   ;;  %v3024_v19 = vpop.permute.xlu0 %507  ;;  %v3870_v10 = vmov 3  }
 0x121   : >> { %v3022_v2 = vpop.permute.xlu1 %504  ;;  %918 = vperm.xlu0 %2253, %v3846_v12  }
 0x122   : >> { %2019 = vmatpush3.bf16.msra.mxu1 %v2258_v28  ;;  %1917 = vmatpush3.bf16.msra.mxu0 %v2258_v28  ;;  %vm551_vm8 = vcmp.eq.s32.totalorder %v3058_v25, %v3022_v2 }
 0x123   : >> { %2012 = vmatprep.subr.bf16.mxu1 %v2259_v27  ;;  %1918 = vmatprep.subr.bf16.mxu0 %v2259_v27 }
 0x124   : >> { %1011 = vperm.xlu1 %2246, %v3849_v11   ;;  %v3031_v29 = vpop.permute.xlu0 %516 }
 0x125   : >> { %v3029_v26 = vpop.permute.xlu1 %510  ;;  %900 = vperm.xlu0 %2253, %v2732_v6  }
 0x126   : >> { %2020 = vmatpush3.bf16.msra.mxu1 %v2259_v27  ;;  %1919 = vmatpush3.bf16.msra.mxu0 %v2259_v27 }
 0x127   : >> { %2013 = vmatprep.subr.bf16.mxu1 %v2260_v32  ;;  %1920 = vmatprep.subr.bf16.mxu0 %v2260_v32 }
 0x128   : >> { %2247 = vset.pattern.permute.xlu1 %v3870_v10  ;;  %v3039_v37 = vpop.permute.xlu0 %522 }
 0x129   : >> { %621 = vperm.xlu1 %2247, %v2738_v9   ;;  %v3037_v11 = vpop.permute.xlu1 %513  ;;  %927 = vperm.xlu0 %2253, %v2750_v15  }
 0x12a   : >> { %2021 = vmatpush3.bf16.msra.mxu1 %v2260_v32  ;;  %1921 = vmatpush3.bf16.msra.mxu0 %v2260_v32  ;;  %v2262_v32 = vld [vmem:[%s3018_s15 + $0x28] sm:$0xff]   ;;  %vm554_vm15 = vcmp.eq.s32.totalorder %v3058_v25, %v3037_v11  ;;  %s2341_s15 = sshll.u32 (%p3660_p10), %s2557_s13, 4  ;;  %s2342_s15 = int_to_ptr.vmem [resolvable:$false] %s2341_s15 }
 0x12b   : >> { %2014 = vmatprep.subr.bf16.mxu1 %v2261_v30  ;;  %1922 = vmatprep.subr.bf16.mxu0 %v2261_v30  ;;  %s2343_s12 = scalar_lea.vmem (%p3660_p10), %s2342_s15, 4096  ;;  %p2344_p7 = scmp.lt.s32.totalorder (%p3660_p10), %s3754_s19, %s2342_s15 }
 0x12c   : >> { %v3046_v28 = vpop.permute.xlu0 %528  ;;  %p2345_p8 = scmp.lt.s32.totalorder (%p3660_p10), %s2343_s12, %s2337_s11 }
 0x12d   : >> { %642 = vperm.xlu1 %2247, %v2752_v16   ;;  %v3044_v10 = vpop.permute.xlu1 %519  ;;  %909 = vperm.xlu0 %2253, %v2738_v9  }
 0x12e   : >> { %2022 = vmatpush3.bf16.msra.mxu1 %v2261_v30  ;;  %1923 = vmatpush3.bf16.msra.mxu0 %v2261_v30  ;;  %v3873_v30 = vmov 0   ;;  %p2346_p11 = por (%p3660_p10), %p2345_p8, %p2344_p7 }
 0x12f   : >> { %v482_v38 = vsel %vm466_vm0, 1, %v3873_v30  ;;  %2015 = vmatprep.subr.bf16.mxu1 %v2262_v32  ;;  %v391_v40 = vsel %vm375_vm1, 1, %v3873_v30  ;;  %v471_v58 = vsel %vm455_vm2, 1, %v3873_v30  ;;  %1924 = vmatprep.subr.bf16.mxu0 %v2262_v32  ;;  %v394_v50 = vsel %vm378_vm3, 1, %v3873_v30 }
 0x130   : >> { %v3055_v33 = vpop.permute.xlu0 %534  ;;  %v392_v31 = vsel %vm376_vm5, 1, %v3873_v30  ;;  %v487_v18 = vadd.s32 %v471_v58, %v391_v40  ;;  %v484_v42 = vsel %vm468_vm6, 1, %v3873_v30  ;;  %v406_v40 = vsel %vm390_vm9, 1, %v3873_v30  ;;  %p2347_p13 = pnand (%p3660_p10), %p2346_p11, %p2340_p4 }
 0x131   : >> { %2249 = vset.pattern.permute.xlu1 %v3871_v22  ;;  %v3053_v27 = vpop.permute.xlu1 %525  ;;  %933 = vperm.xlu0 %2253, %v2754_v17   ;;  %vm464_vm0 = vcmp.eq.s32.totalorder %v3058_v25, %v2988_v36  ;;  %vm552_vm3 = vcmp.eq.s32.totalorder %v3058_v25, %v3024_v19  ;;  %v570_v60 = vsel %vm554_vm15, 1, %v3873_v30  ;;  %v472_v21 = vsel %vm456_vm14, 1, %v3873_v30 }
 0x132   : >> { %990 = vperm.xlu1 %2249, %v3848_v4   ;;  %2023 = vmatpush3.bf16.msra.mxu1 %v2262_v32  ;;  %v402_v4 = vsel %vm386_vm4, 1, %v3873_v30  ;;  %v480_v11 = vsel %vm464_vm0, 1, %v3873_v30  ;;  %v488_v48 = vadd.s32 %v472_v21, %v392_v31  ;;  %vm459_vm9 = vcmp.eq.s32.totalorder %v3058_v25, %v2974_v61 }
 0x133   : >> { %1925 = vmatpush3.bf16.msra.mxu0 %v2262_v32  ;;  %v498_v23 = vadd.s32 %v482_v38, %v402_v4  ;;  %2016 = vmatprep.subr.bf16.mxu1 %v2263_v41  ;;  %v404_v38 = vsel %vm388_vm7, 1, %v3873_v30  ;;  %vm379_vm7 = vcmp.eq.s32.totalorder %v3058_v25, %v2925_v44  ;;  %vm559_vm14 = vcmp.eq.s32.totalorder %v3058_v25, %v3046_v28 }
 0x134   : >> { %v3071_v1 = vpop.permute.xlu0 %540  ;;  %1926 = vmatprep.subr.bf16.mxu0 %v2263_v41  ;;  %v500_v52 = vadd.s32 %v484_v42, %v404_v38  ;;  %vm385_vm15 = vcmp.eq.s32.totalorder %v3058_v25, %v2944_v51  ;;  %vm465_vm0 = vcmp.eq.s32.totalorder %v3058_v25, %v2993_v47 }
 0x135   : >> { %v3069_v24 = vpop.permute.xlu1 %531  ;;  %2255 = vset.pattern.permute.xlu0 %v3871_v22  ;;  %v401_v47 = vsel %vm385_vm15, 1, %v3873_v30  ;;  %vm553_vm15 = vcmp.eq.s32.totalorder %v3058_v25, %v3029_v26 }
 0x136   : >> { %1014 = vperm.xlu1 %2249, %v3846_v12   ;;  %987 = vperm.xlu0 %2255, %v3847_v3   ;;  %vm560_vm4 = vcmp.eq.s32.totalorder %v3058_v25, %v3069_v24 }
 0x137   : >> { %2024 = vmatpush3.bf16.msra.mxu1 %v2263_v41  ;;  %1927 = vmatpush3.bf16.msra.mxu0 %v2263_v41  ;;  %v486_v41 = vsel %vm470_vm13, 1, %v3873_v30  ;;  %v576_v36 = vsel %vm560_vm4, 1, %v3873_v30  ;;  %vm555_vm13 = vcmp.eq.s32.totalorder %v3058_v25, %v3031_v29  ;;  %v475_v29 = vsel %vm459_vm9, 1, %v3873_v30 }
 0x138   : >> { %v3094_v12 = vpop.permute.xlu0 %546  ;;  %2017 = vmatprep.subr.bf16.mxu1 %v2264_v56  ;;  %1928 = vmatprep.subr.bf16.mxu0 %v2264_v56  ;;  %v502_v57 = vadd.s32 %v486_v41, %v406_v40  ;;  %v571_v44 = vsel %vm555_vm13, 1, %v3873_v30  ;;  %vm461_vm4 = vcmp.eq.s32.totalorder %v3058_v25, %v2980_v63 }
 0x139   : >> { %v538_v3 = vpop.permute.xlu1 %537 }
 0x13a   : >> { %vm562_vm10 = vcmp.eq.s32.totalorder %v3058_v25, %v538_v3  ;;  %1017 = vperm.xlu1 %2249, %v2746_v13   ;;  %993 = vperm.xlu0 %2255, %v3845_v5   ;;  %v567_v3 = vsel %vm551_vm8, 1, %v3873_v30  ;;  %vm383_vm8 = vcmp.eq.s32.totalorder %v3058_v25, %v2938_v49  ;;  %v575_v49 = vsel %vm559_vm14, 1, %v3873_v30  ;;  %v2272_v13 = vld [vmem:[#allocation2 + $0x38] sm:$0xff] (%p3660_p10)  }
 0x13b   : >> { %v578_v32 = vsel %vm562_vm10, 1, %v3873_v30  ;;  %2025 = vmatpush3.bf16.msra.mxu1 %v2264_v56  ;;  %1929 = vmatpush3.bf16.msra.mxu0 %v2264_v56  ;;  %vm463_vm10 = vcmp.eq.s32.totalorder %v3058_v25, %v2986_v35  ;;  %vm377_vm14 = vcmp.eq.s32.totalorder %v3058_v25, %v2910_v39 }
 0x13c   : >> { %v3120_v4 = vadd.s32 %v578_v32, %v498_v23  ;;  %v474_v23 = vsel %vm458_vm11, 1, %v3873_v30  ;;  %v583_v32 = vadd.s32 %v567_v3, %v487_v18  ;;  %v479_v28 = vsel %vm463_vm10, 1, %v3873_v30 }
 0x13d   : >> { %v544_v2 = vpop.permute.xlu1 %543  ;;  %v601_v58 = vpop.permute.xlu0 %600  ;;  %v490_v3 = vadd.s32 %v474_v23, %v394_v50  ;;  %v568_v23 = vsel %vm552_vm3, 1, %v3873_v30  ;;  %vm381_vm3 = vcmp.eq.s32.totalorder %v3058_v25, %v2931_v46 }
 0x13e   : >> { %vm564_vm1 = vcmp.eq.s32.totalorder %v3058_v25, %v544_v2  ;;  %2250 = vset.pattern.permute.xlu1 %v3874_v54  ;;  %vm647_vm2 = vcmp.eq.s32.totalorder %v3058_v25, %v601_v58  ;;  %999 = vperm.xlu0 %2255, %v2734_v7   ;;  %v584_v31 = vadd.s32 %v568_v23, %v488_v48  ;;  %v481_v23 = vsel %vm465_vm0, 1, %v3873_v30 }
 0x13f   : >> { %v580_v5 = vsel %vm564_vm1, 1, %v3873_v30  ;;  %711 = vperm.xlu1 %2250, %v2734_v7   ;;  %v663_v18 = vsel %vm647_vm2, 1, %v3873_v30  ;;  %v586_v56 = vadd.s32 %v570_v60, %v490_v3  ;;  %vm561_vm2 = vcmp.eq.s32.totalorder %v3058_v25, %v3055_v33 }
 0x140   : >> { %v3157_v42 = vadd.s32 %v580_v5, %v500_v52  ;;  %v3166_v38 = vadd.s32 %v663_v18, %v583_v32  ;;  %v400_v5 = vsel %vm384_vm12, 1, %v3873_v30  ;;  %v3875_v33 = vmov 5  }
 0x141   : >> { %v550_v2 = vpop.permute.xlu1 %549  ;;  %v610_v50 = vpop.permute.xlu0 %609  ;;  %v496_v54 = vadd.s32 %v480_v11, %v400_v5  ;;  %v399_v5 = vsel %vm383_vm8, 1, %v3873_v30 }
 0x142   : >> { %vm566_vm5 = vcmp.eq.s32.totalorder %v3058_v25, %v550_v2  ;;  %vm650_vm6 = vcmp.eq.s32.totalorder %v3058_v25, %v610_v50  ;;  %1002 = vperm.xlu0 %2255, %v2736_v8   ;;  %v395_v2 = vsel %vm379_vm7, 1, %v3873_v30  ;;  %v495_v50 = vadd.s32 %v479_v28, %v399_v5 }
 0x143   : >> { %v582_v52 = vsel %vm566_vm5, 1, %v3873_v30  ;;  %732 = vperm.xlu1 %2250, %v2748_v14   ;;  %v666_v19 = vsel %vm650_vm6, 1, %v3873_v30  ;;  %v592_v32 = vadd.s32 %v576_v36, %v496_v54  ;;  %v491_v35 = vadd.s32 %v475_v29, %v395_v2 }
 0x144   : >> { %v3189_v40 = vadd.s32 %v582_v52, %v502_v57  ;;  %v3194_v58 = vadd.s32 %v666_v19, %v586_v56  ;;  %v591_v36 = vadd.s32 %v575_v49, %v495_v50  ;;  %vm557_vm7 = vcmp.eq.s32.totalorder %v3058_v25, %v3039_v37 }
 0x145   : >> { %v628_v41 = vpop.permute.xlu0 %627  ;;  %v587_v48 = vadd.s32 %v571_v44, %v491_v35  ;;  %v573_v37 = vsel %vm557_vm7, 1, %v3873_v30 }
 0x146   : >> { %v604_v24 = vpop.permute.xlu1 %603  ;;  %vm656_vm12 = vcmp.eq.s32.totalorder %v3058_v25, %v628_v41  ;;  %1026 = vperm.xlu0 %2255, %v2752_v16  }
 0x147   : >> { %vm648_vm11 = vcmp.eq.s32.totalorder %v3058_v25, %v604_v24  ;;  %714 = vperm.xlu1 %2250, %v2736_v8   ;;  %v672_v18 = vsel %vm656_vm12, 1, %v3873_v30  ;;  %vm457_vm12 = vcmp.eq.s32.totalorder %v3058_v25, %v2968_v59 }
 0x148   : >> { %v664_v60 = vsel %vm648_vm11, 1, %v3873_v30  ;;  %v3214_v3 = vadd.s32 %v672_v18, %v592_v32  ;;  %v397_v32 = vsel %vm381_vm3, 1, %v3873_v30  ;;  %v473_v59 = vsel %vm457_vm12, 1, %v3873_v30 }
 0x149   : >> { %v3212_v21 = vadd.s32 %v664_v60, %v584_v31  ;;  %v634_v57 = vpop.permute.xlu0 %633  ;;  %v497_v31 = vadd.s32 %v481_v23, %v401_v47  ;;  %v477_v60 = vsel %vm461_vm4, 1, %v3873_v30  ;;  %vm556_vm12 = vcmp.eq.s32.totalorder %v3058_v25, %v3044_v10 }
 0x14a   : >> { %v3232_v11 = vpop.permute.xlu1 %606  ;;  %vm658_vm1 = vcmp.eq.s32.totalorder %v3058_v25, %v634_v57  ;;  %v493_v46 = vadd.s32 %v477_v60, %v397_v32 }
 0x14b   : >> { %738 = vperm.xlu1 %2250, %v2752_v16   ;;  %v674_v61 = vsel %vm658_vm1, 1, %v3873_v30  ;;  %vm649_vm0 = vcmp.eq.s32.totalorder %v3058_v25, %v3232_v11 }
 0x14c   : >> { %v3246_v51 = vadd.s32 %v674_v61, %v3120_v4  ;;  %v577_v4 = vsel %vm561_vm2, 1, %v3873_v30  ;;  %v589_v49 = vadd.s32 %v573_v37, %v493_v46  ;;  %v665_v26 = vsel %vm649_vm0, 1, %v3873_v30 }
 0x14d   : >> { %v613_v52 = vpop.permute.xlu0 %612  ;;  %v593_v5 = vadd.s32 %v577_v4, %v497_v31 }
 0x14e   : >> { %v625_v56 = vpop.permute.xlu1 %624  ;;  %vm651_vm6 = vcmp.eq.s32.totalorder %v3058_v25, %v613_v52 }
 0x14f   : >> { %vm655_vm5 = vcmp.eq.s32.totalorder %v3058_v25, %v625_v56  ;;  %2252 = vset.pattern.permute.xlu1 %v3875_v33  ;;  %v667_v54 = vsel %vm651_vm6, 1, %v3873_v30 }
 0x150   : >> { %v671_v19 = vsel %vm655_vm5, 1, %v3873_v30  ;;  %804 = vperm.xlu1 %2252, %v2732_v6   ;;  %v3265_v41 = vadd.s32 %v667_v54, %v587_v48  ;;  %v393_v48 = vsel %vm377_vm14, 1, %v3873_v30  ;;  %vm467_vm14 = vcmp.eq.s32.totalorder %v3058_v25, %v2999_v34 }
 0x151   : >> { %v3263_v24 = vadd.s32 %v671_v19, %v591_v36  ;;  %v640_v2 = vpop.permute.xlu0 %639  ;;  %v569_v36 = vsel %vm553_vm15, 1, %v3873_v30  ;;  %v489_v4 = vadd.s32 %v473_v59, %v393_v48  ;;  %vm563_vm15 = vcmp.eq.s32.totalorder %v3058_v25, %v3071_v1 }
 0x152   : >> { %v631_v18 = vpop.permute.xlu1 %630  ;;  %vm660_vm9 = vcmp.eq.s32.totalorder %v3058_v25, %v640_v2  ;;  %v579_v34 = vsel %vm563_vm15, 1, %v3873_v30  ;;  %vm565_vm15 = vcmp.eq.s32.totalorder %v3058_v25, %v3094_v12 }
 0x153   : >> { %vm657_vm8 = vcmp.eq.s32.totalorder %v3058_v25, %v631_v18  ;;  %v676_v28 = vsel %vm660_vm9, 1, %v3873_v30 }
 0x154   : >> { %v673_v29 = vsel %vm657_vm8, 1, %v3873_v30  ;;  %828 = vperm.xlu1 %2252, %v2748_v14   ;;  %v3282_v63 = vadd.s32 %v676_v28, %v3157_v42 }
 0x155   : >> { %v689_v57 = vadd.s32 %v673_v29, %v593_v5  ;;  %v619_v44 = vpop.permute.xlu0 %618 }
 0x156   : >> { %vm653_vm10 = vcmp.eq.s32.totalorder %v3058_v25, %v619_v44 }
 0x157   : >> { %v697_v61 = vpop.permute.xlu1 %696  ;;  %v669_v35 = vsel %vm653_vm10, 1, %v3873_v30  ;;  %vm460_vm10 = vcmp.eq.s32.totalorder %v3058_v25, %v2976_v62 }
 0x158   : >> { %vm743_vm11 = vcmp.eq.s32.totalorder %v3058_v25, %v697_v61  ;;  %831 = vperm.xlu1 %2252, %v2750_v15   ;;  %v3288_v50 = vadd.s32 %v669_v35, %v589_v49 }
 0x159   : >> { %v759_v47 = vsel %vm743_vm11, 1, %v3873_v30  ;;  %v646_v23 = vpop.permute.xlu0 %645  ;;  %vm380_vm11 = vcmp.eq.s32.totalorder %v3058_v25, %v2923_v43 }
 0x15a   : >> { %v3294_v42 = vadd.s32 %v759_v47, %v3166_v38  ;;  %vm662_vm13 = vcmp.eq.s32.totalorder %v3058_v25, %v646_v23  ;;  %v396_v62 = vsel %vm380_vm11, 1, %v3873_v30  ;;  %vm389_vm11 = vcmp.eq.s32.totalorder %v3058_v25, %v2956_v55 }
 0x15b   : >> { %v3297_v56 = vpop.permute.xlu1 %720  ;;  %v678_v52 = vsel %vm662_vm13, 1, %v3873_v30  ;;  %vm387_vm13 = vcmp.eq.s32.totalorder %v3058_v25, %v2950_v53 }
 0x15c   : >> { %813 = vperm.xlu1 %2252, %v2738_v9   ;;  %v694_v38 = vadd.s32 %v678_v52, %v3189_v40  ;;  %v585_v40 = vadd.s32 %v569_v36, %v489_v4  ;;  %v403_v10 = vsel %vm387_vm13, 1, %v3873_v30 }
 0x15e   : >> { %v700_v39 = vpop.permute.xlu0 %699  ;;  %v681_v32 = vadd.s32 %v665_v26, %v585_v40 }
 0x15f   : >> { %v3311_v33 = vpop.permute.xlu1 %723  ;;  %vm744_vm1 = vcmp.eq.s32.totalorder %v3058_v25, %v700_v39 }
 0x160   : >> { %837 = vperm.xlu1 %2252, %v2754_v17   ;;  %v760_v19 = vsel %vm744_vm1, 1, %v3873_v30 }
 0x161   : >> { %v776_v54 = vadd.s32 %v760_v19, %v3212_v21 }
 0x162   : >> { %v703_v31 = vpop.permute.xlu0 %702 }
 0x163   : >> { %v706_v11 = vpop.permute.xlu1 %705  ;;  %vm745_vm3 = vcmp.eq.s32.totalorder %v3058_v25, %v703_v31 }
 0x164   : >> { %vm746_vm2 = vcmp.eq.s32.totalorder %v3058_v25, %v706_v11  ;;  %2254 = vset.pattern.permute.xlu1 %v3868_v20  ;;  %v761_v18 = vsel %vm745_vm3, 1, %v3873_v30  ;;  %vm752_vm3 = vcmp.eq.s32.totalorder %v3058_v25, %v3311_v33 }
 0x165   : >> { %v762_v60 = vsel %vm746_vm2, 1, %v3873_v30  ;;  %903 = vperm.xlu1 %2254, %v2734_v7   ;;  %v3327_v5 = vadd.s32 %v761_v18, %v681_v32  ;;  %v572_v18 = vsel %vm556_vm12, 1, %v3873_v30  ;;  %vm751_vm2 = vcmp.eq.s32.totalorder %v3058_v25, %v3297_v56  ;;  %v2276_v7 = vld [vmem:[#allocation5 + $0x18] sm:$0xff] (%p3660_p10)  }
 0x166   : >> { %v3325_v2 = vadd.s32 %v762_v60, %v3194_v58  ;;  %v727_v37 = vpop.permute.xlu0 %726  ;;  %v476_v60 = vsel %vm460_vm10, 1, %v3873_v30  ;;  %v768_v56 = vsel %vm752_vm3, 1, %v3873_v30  ;;  %vm382_vm10 = vcmp.eq.s32.totalorder %v3058_v25, %v2929_v45 }
 0x167   : >> { %v730_v21 = vpop.permute.xlu1 %729  ;;  %vm753_vm5 = vcmp.eq.s32.totalorder %v3058_v25, %v727_v37  ;;  %v492_v43 = vadd.s32 %v476_v60, %v396_v62  ;;  %v483_v37 = vsel %vm467_vm14, 1, %v3873_v30  ;;  %vm558_vm12 = vcmp.eq.s32.totalorder %v3058_v25, %v3053_v27 }
 0x168   : >> { %vm754_vm4 = vcmp.eq.s32.totalorder %v3058_v25, %v730_v21  ;;  %v769_v20 = vsel %vm753_vm5, 1, %v3873_v30  ;;  %v398_v45 = vsel %vm382_vm10, 1, %v3873_v30  ;;  %v574_v55 = vsel %vm558_vm12, 1, %v3873_v30 }
 0x169   : >> { %v770_v29 = vsel %vm754_vm4, 1, %v3873_v30  ;;  %924 = vperm.xlu1 %2254, %v2748_v14   ;;  %v3337_v46 = vadd.s32 %v769_v20, %v689_v57  ;;  %v588_v20 = vadd.s32 %v572_v18, %v492_v43 }
 0x16a   : >> { %v3335_v28 = vadd.s32 %v770_v29, %v3246_v51  ;;  %v709_v58 = vpop.permute.xlu0 %708 }
 0x16b   : >> { %vm747_vm6 = vcmp.eq.s32.totalorder %v3058_v25, %v709_v58 }
 0x16c   : >> { %v796_v44 = vpop.permute.xlu1 %795  ;;  %v763_v49 = vsel %vm747_vm6, 1, %v3873_v30 }
 0x16d   : >> { %vm840_vm7 = vcmp.eq.s32.totalorder %v3058_v25, %v796_v44  ;;  %906 = vperm.xlu1 %2254, %v2736_v8   ;;  %v3344_v61 = vadd.s32 %v763_v49, %v3265_v41  ;;  %v499_v44 = vadd.s32 %v483_v37, %v403_v10  ;;  %v2271_v8 = vld [vmem:[#allocation2 + $0x30] sm:$0xff] (%p3660_p10)  }
 0x16e   : >> { %v856_v35 = vsel %vm840_vm7, 1, %v3873_v30  ;;  %v736_v51 = vpop.permute.xlu0 %735 }
 0x16f   : >> { %v3347_v47 = vadd.s32 %v856_v35, %v776_v54  ;;  %vm756_vm8 = vcmp.eq.s32.totalorder %v3058_v25, %v736_v51  ;;  %v595_v51 = vadd.s32 %v579_v34, %v499_v44  ;;  %v3876_v34 = vld [vmem:[#allocation35_spill] sm:$0xff] }
 0x170   : >> { %v3350_v57 = vpop.permute.xlu1 %816  ;;  %v772_v23 = vsel %vm756_vm8, 1, %v3873_v30  ;;  %vm462_vm8 = vcmp.eq.s32.totalorder %v3058_v25, %v2982_v0  ;;  %vm469_vm13 = vcmp.eq.s32.totalorder %v3058_v25, %v3876_v34 }
 0x171   : >> { %930 = vperm.xlu1 %2254, %v2752_v16   ;;  %v3355_v52 = vadd.s32 %v772_v23, %v3282_v63  ;;  %vm847_vm4 = vcmp.eq.s32.totalorder %v3058_v25, %v3350_v57  ;;  %v478_v0 = vsel %vm462_vm8, 1, %v3873_v30 }
 0x172   : >> { %v3357_v59 = vpop.permute.xlu0 %717  ;;  %v863_v62 = vsel %vm847_vm4, 1, %v3873_v30 }
 0x174   : >> { %v3359_v41 = vpop.permute.xlu1 %798 }
 0x175   : >> { %2256 = vset.pattern.permute.xlu1 %v3871_v22  ;;  %vm841_vm3 = vcmp.eq.s32.totalorder %v3058_v25, %v3359_v41 }
 0x176   : >> { %996 = vperm.xlu1 %2256, %v2732_v6   ;;  %v742_v48 = vpop.permute.xlu0 %741  ;;  %v2270_v6 = vld [vmem:[#allocation2 + $0x28] sm:$0xff] (%p3660_p10)  }
 0x177   : >> { %vm758_vm9 = vcmp.eq.s32.totalorder %v3058_v25, %v742_v48 }
 0x178   : >> { %v3364_v36 = vpop.permute.xlu1 %822  ;;  %v774_v39 = vsel %vm758_vm9, 1, %v3873_v30 }
 0x179   : >> { %v3367_v4 = vadd.s32 %v774_v39, %v694_v38  ;;  %v767_v39 = vsel %vm751_vm2, 1, %v3873_v30 }
 0x17a   : >> { %1020 = vperm.xlu1 %2256, %v2748_v14   ;;  %v783_v43 = vadd.s32 %v767_v39, %v3263_v24  ;;  %v494_v39 = vadd.s32 %v478_v0, %v398_v45  ;;  %v2278_v14 = vld [vmem:[#allocation5 + $0x28] sm:$0xff] (%p3660_p10)  }
 0x17b   : >> { %v3370_v63 = vpop.permute.xlu0 %792 }
 0x17c   : >> { %vm839_vm2 = vcmp.eq.s32.totalorder %v3058_v25, %v3370_v63 }
 0x17d   : >> { %v3372_v26 = vpop.permute.xlu1 %888 }
 0x17e   : >> { %1023 = vperm.xlu1 %2256, %v2750_v15  }
 0x17f   : >> { %v820_v22 = vpop.permute.xlu0 %819 }
 0x180   : >> { %vm848_vm5 = vcmp.eq.s32.totalorder %v3058_v25, %v820_v22  ;;  %v784_v22 = vadd.s32 %v768_v56, %v3214_v3  ;;  %v485_v56 = vsel %vm469_vm13, 1, %v3873_v30 }
 0x181   : >> { %v913_v19 = vpop.permute.xlu1 %912  ;;  %v864_v33 = vsel %vm848_vm5, 1, %v3873_v30  ;;  %vm849_vm5 = vcmp.eq.s32.totalorder %v3058_v25, %v3364_v36 }
 0x182   : >> { %1005 = vperm.xlu1 %2256, %v2738_v9   ;;  %vm943_vm6 = vcmp.eq.s32.totalorder %v3058_v25, %v913_v19  ;;  %v879_v19 = vadd.s32 %v863_v62, %v783_v43  ;;  %v2277_v9 = vld [vmem:[#allocation5 + $0x20] sm:$0xff] (%p3660_p10)  }
 0x183   : >> { %v3376_v40 = vpop.permute.xlu0 %801  ;;  %v959_v57 = vsel %vm943_vm6, 1, %v3873_v30  ;;  %vm935_vm6 = vcmp.eq.s32.totalorder %v3058_v25, %v3372_v26 }
 0x184   : >> { %v951_v36 = vsel %vm935_vm6, 1, %v3873_v30 }
 0x185   : >> { %v916_v54 = vpop.permute.xlu1 %915 }
 0x186   : >> { %1029 = vperm.xlu1 %2256, %v2754_v17   ;;  %vm944_vm7 = vcmp.eq.s32.totalorder %v3058_v25, %v916_v54  ;;  %v880_v54 = vadd.s32 %v864_v33, %v784_v22 }
 0x187   : >> { %v3379_v11 = vpop.permute.xlu0 %825  ;;  %v960_v37 = vsel %vm944_vm7, 1, %v3873_v30  ;;  %vm842_vm7 = vcmp.eq.s32.totalorder %v3058_v25, %v3376_v40 }
 0x188   : >> { %v858_v40 = vsel %vm842_vm7, 1, %v3873_v30  ;;  %vm850_vm10 = vcmp.eq.s32.totalorder %v3058_v25, %v3379_v11 }
 0x189   : >> { %v3381_v38 = vpop.permute.xlu1 %897 }
 0x18a   : >> { %vm938_vm12 = vcmp.eq.s32.totalorder %v3058_v25, %v3381_v38 }
 0x18b   : >> { %v3385_v31 = vpop.permute.xlu0 %807 }
 0x18d   : >> { %v3391_v32 = vpop.permute.xlu1 %921 }
 0x18f   : >> { %v3400_v21 = vpop.permute.xlu0 %810 }
 0x190   : >> { %vm845_vm6 = vcmp.eq.s32.totalorder %v3058_v25, %v3400_v21 }
 0x192   : >> { %v616_v29 = vpop.permute.xlu1 %615 }
 0x193   : >> { %vm652_vm0 = vcmp.eq.s32.totalorder %v3058_v25, %v616_v29  ;;  %v3409_v58 = vpop.permute.xlu0 %834 }
 0x194   : >> { %v668_v53 = vsel %vm652_vm0, 1, %v3873_v30  ;;  %vm750_vm0 = vcmp.eq.s32.totalorder %v3058_v25, %v3357_v59  ;;  %v855_v59 = vsel %vm839_vm2, 1, %v3873_v30 }
 0x195   : >> { %v3411_v49 = vadd.s32 %v668_v53, %v588_v20  ;;  %v975_v20 = vadd.s32 %v959_v57, %v879_v19  ;;  %v976_v53 = vadd.s32 %v960_v37, %v880_v54  ;;  %v590_v57 = vadd.s32 %v574_v55, %v494_v39 }
 0x196   : >> { %v637_v35 = vpop.permute.xlu1 %636 }
 0x197   : >> { %vm659_vm1 = vcmp.eq.s32.totalorder %v3058_v25, %v637_v35 }
 0x198   : >> { %v675_v1 = vsel %vm659_vm1, 1, %v3873_v30  ;;  %v3419_v48 = vpop.permute.xlu0 %891 }
 0x199   : >> { %v3417_v23 = vadd.s32 %v675_v1, %v595_v51  ;;  %v405_v1 = vsel %vm389_vm11, 1, %v3873_v30 }
 0x19a   : >> { %v501_v12 = vadd.s32 %v485_v56, %v405_v1  ;;  %v954_v1 = vsel %vm938_vm12, 1, %v3873_v30 }
 0x19b   : >> { %v3426_v60 = vpop.permute.xlu1 %984 }
 0x19c   : >> { %v3432_v18 = vpop.permute.xlu0 %894  ;;  %vm1031_vm8 = vcmp.eq.s32.totalorder %v3058_v25, %v3426_v60 }
 0x19d   : >> { %v1047_v60 = vsel %vm1031_vm8, 1, %v3873_v30  ;;  %vm937_vm13 = vcmp.eq.s32.totalorder %v3058_v25, %v3432_v18  ;;  %vm853_vm8 = vcmp.eq.s32.totalorder %v3058_v25, %v3409_v58 }
 0x19e   : >> { %v953_v18 = vsel %vm937_vm13, 1, %v3873_v30 }
 0x19f   : >> { %v1009_v10 = vpop.permute.xlu1 %1008 }
 0x1a0   : >> { %vm1039_vm9 = vcmp.eq.s32.totalorder %v3058_v25, %v1009_v10  ;;  %v3444_v24 = vpop.permute.xlu0 %918  ;;  %v581_v10 = vsel %vm565_vm15, 1, %v3873_v30 }
 0x1a1   : >> { %v1055_v29 = vsel %vm1039_vm9, 1, %v3873_v30  ;;  %v597_v54 = vadd.s32 %v581_v10, %v501_v12  ;;  %vm936_vm9 = vcmp.eq.s32.totalorder %v3058_v25, %v3419_v48  ;;  %vm945_vm11 = vcmp.eq.s32.totalorder %v3058_v25, %v3444_v24 }
 0x1a2   : >> { %v1071_v44 = vadd.s32 %v1055_v29, %v975_v20  ;;  %v766_v20 = vsel %vm750_vm0, 1, %v3873_v30  ;;  %v952_v11 = vsel %vm936_vm9, 1, %v3873_v30  ;;  %v874_v24 = vadd.s32 %v858_v40, %v3325_v2 }
 0x1a3   : >> { %v1012_v3 = vpop.permute.xlu1 %1011  ;;  %v968_v56 = vadd.s32 %v952_v11, %v3347_v47 }
 0x1a4   : >> { %vm1040_vm14 = vcmp.eq.s32.totalorder %v3058_v25, %v1012_v3  ;;  %v3457_v51 = vpop.permute.xlu0 %900  ;;  %v1087_v43 = vcvt.s32.f32 %v1071_v44  ;;  %v871_v44 = vadd.s32 %v855_v59, %v3294_v42  ;;  %v970_v10 = vadd.s32 %v954_v1, %v874_v24 }
 0x1a5   : >> { %v1056_v35 = vsel %vm1040_vm14, 1, %v3873_v30  ;;  %vm946_vm14 = vcmp.eq.s32.totalorder %v3058_v25, %v3391_v32 }
 0x1a6   : >> { %v1072_v27 = vadd.s32 %v1056_v35, %v976_v53  ;;  %v857_v53 = vsel %vm841_vm3, 1, %v3873_v30  ;;  %v865_v35 = vsel %vm849_vm5, 1, %v3873_v30  ;;  %v967_v55 = vadd.s32 %v951_v36, %v871_v44 }
 0x1a7   : >> { %v873_v42 = vadd.s32 %v857_v53, %v3327_v5  ;;  %v881_v48 = vadd.s32 %v865_v35, %v3337_v46  ;;  %v866_v5 = vsel %vm850_vm10, 1, %v3873_v30  ;;  %v962_v32 = vsel %vm946_vm14, 1, %v3873_v30 }
 0x1a8   : >> { %v622_v62 = vpop.permute.xlu1 %621  ;;  %v1088_v33 = vcvt.s32.f32 %v1072_v27  ;;  %v3469_v22 = vpop.permute.xlu0 %927  ;;  %v961_v27 = vsel %vm945_vm11, 1, %v3873_v30  ;;  %v1063_v39 = vadd.s32 %v1047_v60, %v967_v55  ;;  %vm939_vm10 = vcmp.eq.s32.totalorder %v3058_v25, %v3457_v51 }
 0x1a9   : >> { %vm654_vm1 = vcmp.eq.s32.totalorder %v3058_v25, %v622_v62  ;;  %v882_v62 = vadd.s32 %v866_v5, %v3335_v28  ;;  %v969_v12 = vadd.s32 %v953_v18, %v873_v42  ;;  %v955_v58 = vsel %vm939_vm10, 1, %v3873_v30 }
 0x1aa   : >> { %v670_v19 = vsel %vm654_vm1, 1, %v3873_v30  ;;  %v1099_v37 = vpack.c.bf16 %v1088_v33, %v1087_v43  ;;  %v977_v43 = vadd.s32 %v961_v27, %v881_v48  ;;  %vm948_vm12 = vcmp.eq.s32.totalorder %v3058_v25, %v3469_v22 }
 0x1ab   : >> { %v686_v29 = vadd.s32 %v670_v19, %v590_v57  ;;  %v964_v51 = vsel %vm948_vm12, 1, %v3873_v30 }
 0x1ac   : >> { %v643_v0 = vpop.permute.xlu1 %642  ;;  %1938 = vmatprep.mubr.bf16.mxu1 %v1099_v37  ;;  %v3479_v3 = vpop.permute.xlu0 %909 }
 0x1ad   : >> { %vm661_vm4 = vcmp.eq.s32.totalorder %v3058_v25, %v643_v0  ;;  %v3481_v34 = vadd.s32 %v766_v20, %v686_v29  ;;  %v978_v29 = vadd.s32 %v962_v32, %v882_v62  ;;  %v1079_v20 = vcvt.s32.f32 %v1063_v39 }
 0x1ae   : >> { %v677_v63 = vsel %vm661_vm4, 1, %v3873_v30  ;;  %vm844_vm4 = vcmp.eq.s32.totalorder %v3058_v25, %v3385_v31  ;;  %vm942_vm14 = vcmp.eq.s32.totalorder %v3058_v25, %v3479_v3 }
 0x1af   : >> { %v3490_v41 = vadd.s32 %v677_v63, %v597_v54  ;;  %v860_v5 = vsel %vm844_vm4, 1, %v3873_v30 }
 0x1b0   : >> { %v3500_v45 = vpop.permute.xlu0 %933 }
 0x1b1   : >> { %v991_v26 = vpop.permute.xlu1 %990 }
 0x1b2   : >> { %vm1033_vm15 = vcmp.eq.s32.totalorder %v3058_v25, %v991_v26 }
 0x1b3   : >> { %v1049_v33 = vsel %vm1033_vm15, 1, %v3873_v30 }
 0x1b4   : >> { %v1065_v0 = vadd.s32 %v1049_v33, %v969_v12 }
 0x1b5   : >> { %v1015_v38 = vpop.permute.xlu1 %1014  ;;  %v988_v46 = vpop.permute.xlu0 %987 }
 0x1b6   : >> { %vm1041_vm0 = vcmp.eq.s32.totalorder %v3058_v25, %v1015_v38  ;;  %vm1032_vm1 = vcmp.eq.s32.totalorder %v3058_v25, %v988_v46  ;;  %v1081_v42 = vcvt.s32.f32 %v1065_v0  ;;  %v861_v46 = vsel %vm845_vm6, 1, %v3873_v30 }
 0x1b7   : >> { %v1057_v2 = vsel %vm1041_vm0, 1, %v3873_v30  ;;  %v1048_v57 = vsel %vm1032_vm1, 1, %v3873_v30  ;;  %vm950_vm0 = vcmp.eq.s32.totalorder %v3058_v25, %v3500_v45 }
 0x1b8   : >> { %v1064_v37 = vadd.s32 %v1048_v57, %v968_v56  ;;  %v1073_v54 = vadd.s32 %v1057_v2, %v977_v43  ;;  %v869_v56 = vsel %vm853_vm8, 1, %v3873_v30 }
 0x1b9   : >> { %v1018_v19 = vpop.permute.xlu1 %1017  ;;  %v994_v47 = vpop.permute.xlu0 %993 }
 0x1ba   : >> { %vm1042_vm2 = vcmp.eq.s32.totalorder %v3058_v25, %v1018_v19  ;;  %vm1034_vm3 = vcmp.eq.s32.totalorder %v3058_v25, %v994_v47  ;;  %v1080_v28 = vcvt.s32.f32 %v1064_v37  ;;  %v1089_v36 = vcvt.s32.f32 %v1073_v54 }
 0x1bb   : >> { %v1058_v59 = vsel %vm1042_vm2, 1, %v3873_v30  ;;  %v1050_v53 = vsel %vm1034_vm3, 1, %v3873_v30 }
 0x1bc   : >> { %v1074_v63 = vadd.s32 %v1058_v59, %v978_v29  ;;  %v1066_v44 = vadd.s32 %v1050_v53, %v970_v10  ;;  %v1095_v35 = vpack.c.bf16 %v1080_v28, %v1079_v20  ;;  %v958_v29 = vsel %vm942_vm14, 1, %v3873_v30 }
 0x1bd   : >> { %v966_v20 = vsel %vm950_vm0, 1, %v3873_v30 }
 0x1be   : >> { %v1090_v26 = vcvt.s32.f32 %v1074_v63  ;;  %v712_v40 = vpop.permute.xlu1 %711  ;;  %v1082_v60 = vcvt.s32.f32 %v1066_v44  ;;  %1930 = vmatprep.mubr.bf16.mxu0 %v1095_v35  ;;  %v1000_v63 = vpop.permute.xlu0 %999 }
 0x1bf   : >> { %vm748_vm5 = vcmp.eq.s32.totalorder %v3058_v25, %v712_v40  ;;  %vm1036_vm3 = vcmp.eq.s32.totalorder %v3058_v25, %v1000_v63 }
 0x1c0   : >> { %v764_v48 = vsel %vm748_vm5, 1, %v3873_v30  ;;  %v1100_v55 = vpack.c.bf16 %v1090_v26, %v1089_v36  ;;  %v1096_v24 = vpack.c.bf16 %v1082_v60, %v1081_v42 }
 0x1c1   : >> { %v780_v11 = vadd.s32 %v764_v48, %v3411_v49 }
 0x1c2   : >> { %v733_v27 = vpop.permute.xlu1 %732  ;;  %1939 = vmatmul.mubr.bf16.vlgmr.msra.gmra.mrb[0].mxu1 %v1100_v55  ;;  %1931 = vmatmul.mubr.bf16.vlgmr.msra.gmra.mrb[0].mxu0 %v1096_v24  ;;  %v1003_v60 = vpop.permute.xlu0 %1002 }
 0x1c3   : >> { %v876_v38 = vadd.s32 %v860_v5, %v780_v11  ;;  %vm755_vm4 = vcmp.eq.s32.totalorder %v3058_v25, %v733_v27  ;;  %vm1037_vm10 = vcmp.eq.s32.totalorder %v3058_v25, %v1003_v60 }
 0x1c4   : >> { %v771_v35 = vsel %vm755_vm4, 1, %v3873_v30 }
 0x1c5   : >> { %v787_v42 = vadd.s32 %v771_v35, %v3417_v23  ;;  %v3883_v35 = vld [vmem:[#allocation34_spill] sm:$0xff] }
 0x1c6   : >> { %v715_v1 = vpop.permute.xlu1 %714 }
 0x1c7   : >> { %vm749_vm7 = vcmp.eq.s32.totalorder %v3058_v25, %v715_v1 }
 0x1c8   : >> { %v765_v31 = vsel %vm749_vm7, 1, %v3873_v30 }
 0x1c9   : >> { %v781_v18 = vadd.s32 %v765_v31, %v3288_v50 }
 0x1ca   : >> { %v739_v49 = vpop.permute.xlu1 %738 }
 0x1cb   : >> { %vm757_vm9 = vcmp.eq.s32.totalorder %v3058_v25, %v739_v49  ;;  %v3550_v39 = vadd.s32 %v861_v46, %v781_v18  ;;  %v1027_v49 = vpop.permute.xlu0 %1026 }
 0x1cc   : >> { %v773_v32 = vsel %vm757_vm9, 1, %v3873_v30 }
 0x1cd   : >> { %v789_v21 = vadd.s32 %v773_v32, %v3490_v41 }
 0x1cf   : >> { %v805_v50 = vpop.permute.xlu1 %804  ;;  %v3557_v2 = vadd.s32 %v869_v56, %v789_v21  ;;  %v1053_v21 = vsel %vm1037_vm10, 1, %v3873_v30 }
 0x1d0   : >> { %vm843_vm11 = vcmp.eq.s32.totalorder %v3058_v25, %v805_v50 }
 0x1d1   : >> { %v859_v62 = vsel %vm843_vm11, 1, %v3873_v30 }
 0x1d2   : >> { %v875_v43 = vadd.s32 %v859_v62, %v3344_v61 }
 0x1d3   : >> { %v829_v33 = vpop.permute.xlu1 %828 }
 0x1d4   : >> { %v971_v57 = vadd.s32 %v955_v58, %v875_v43  ;;  %vm851_vm5 = vcmp.eq.s32.totalorder %v3058_v25, %v829_v33 }
 0x1d5   : >> { %v867_v26 = vsel %vm851_vm5, 1, %v3873_v30 }
 0x1d6   : >> { %v883_v11 = vadd.s32 %v867_v26, %v787_v42  ;;  %v3884_v26 = vld [vmem:[#allocation23_spill] sm:$0xff] }
 0x1d7   : >> { %v832_v41 = vpop.permute.xlu1 %831 }
 0x1d8   : >> { %vm852_vm13 = vcmp.eq.s32.totalorder %v3058_v25, %v832_v41 }
 0x1d9   : >> { %v868_v10 = vsel %vm852_vm13, 1, %v3873_v30  ;;  %vm1045_vm13 = vcmp.eq.s32.totalorder %v3058_v25, %v1027_v49  ;;  %v3893_v49 = vld [vmem:[#allocation30_spill] sm:$0xff] }
 0x1da   : >> { %v884_v12 = vadd.s32 %v868_v10, %v3355_v52 }
 0x1db   : >> { %v814_v19 = vpop.permute.xlu1 %813 }
 0x1dc   : >> { %vm846_vm15 = vcmp.eq.s32.totalorder %v3058_v25, %v814_v19  ;;  %v980_v61 = vadd.s32 %v964_v51, %v884_v12  ;;  %v1061_v51 = vsel %vm1045_vm13, 1, %v3873_v30 }
 0x1dd   : >> { %v862_v37 = vsel %vm846_vm15, 1, %v3873_v30 }
 0x1de   : >> { %v878_v22 = vadd.s32 %v862_v37, %v3481_v34 }
 0x1df   : >> { %v838_v54 = vpop.permute.xlu1 %837 }
 0x1e0   : >> { %vm854_vm1 = vcmp.eq.s32.totalorder %v3058_v25, %v838_v54  ;;  %v974_v52 = vadd.s32 %v958_v29, %v878_v22 }
 0x1e1   : >> { %v870_v47 = vsel %vm854_vm1, 1, %v3873_v30 }
 0x1e2   : >> { %v886_v3 = vadd.s32 %v870_v47, %v3367_v4  ;;  %v1052_v4 = vsel %vm1036_vm3, 1, %v3873_v30 }
 0x1e4   : >> { %v904_v0 = vpop.permute.xlu1 %903  ;;  %v3581_v59 = vadd.s32 %v966_v20, %v886_v3 }
 0x1e5   : >> { %vm940_vm2 = vcmp.eq.s32.totalorder %v3058_v25, %v904_v0 }
 0x1e6   : >> { %v956_v53 = vsel %vm940_vm2, 1, %v3873_v30 }
 0x1e7   : >> { %v972_v44 = vadd.s32 %v956_v53, %v876_v38 }
 0x1e8   : >> { %v925_v28 = vpop.permute.xlu1 %924 }
 0x1e9   : >> { %v1068_v40 = vadd.s32 %v1052_v4, %v972_v44  ;;  %vm947_vm6 = vcmp.eq.s32.totalorder %v3058_v25, %v925_v28 }
 0x1ea   : >> { %v963_v24 = vsel %vm947_vm6, 1, %v3873_v30 }
 0x1eb   : >> { %v1084_v27 = vcvt.s32.f32 %v1068_v40  ;;  %v979_v31 = vadd.s32 %v963_v24, %v883_v11  ;;  %v3888_v11 = vld [vmem:[#allocation25_spill] sm:$0xff] }
 0x1ec   : >> { %v907_v34 = vpop.permute.xlu1 %906 }
 0x1ed   : >> { %vm941_vm8 = vcmp.eq.s32.totalorder %v3058_v25, %v907_v34 }
 0x1ee   : >> { %v957_v38 = vsel %vm941_vm8, 1, %v3873_v30 }
 0x1ef   : >> { %v973_v46 = vadd.s32 %v957_v38, %v3550_v39  ;;  %v3890_v38 = vld [vmem:[#allocation33_spill] sm:$0xff] }
 0x1f0   : >> { %v931_v45 = vpop.permute.xlu1 %930 }
 0x1f1   : >> { %vm949_vm11 = vcmp.eq.s32.totalorder %v3058_v25, %v931_v45  ;;  %v1069_v43 = vadd.s32 %v1053_v21, %v973_v46  ;;  %v3879_v45 = vld [vmem:[#allocation32_spill] sm:$0xff]  ;;  %v3895_v21 = vld [vmem:[#allocation27_spill] sm:$0xff] }
 0x1f2   : >> { %v965_v50 = vsel %vm949_vm11, 1, %v3873_v30 }
 0x1f3   : >> { %v1085_v22 = vcvt.s32.f32 %v1069_v43 }
 0x1f5   : >> { %v997_v36 = vpop.permute.xlu1 %996 }
 0x1f6   : >> { %vm1035_vm7 = vcmp.eq.s32.totalorder %v3058_v25, %v997_v36 }
 0x1f7   : >> { %v1051_v48 = vsel %vm1035_vm7, 1, %v3873_v30 }
 0x1f8   : >> { %v1067_v55 = vadd.s32 %v1051_v48, %v971_v57  ;;  %v981_v57 = vadd.s32 %v965_v50, %v3557_v2  ;;  %v3886_v48 = vld [vmem:[#allocation31_spill] sm:$0xff] }
 0x1f9   : >> { %v1021_v5 = vpop.permute.xlu1 %1020 }
 0x1fa   : >> { %v1083_v1 = vcvt.s32.f32 %v1067_v55  ;;  %vm1043_vm9 = vcmp.eq.s32.totalorder %v3058_v25, %v1021_v5  ;;  %v1077_v29 = vadd.s32 %v1061_v51, %v981_v57 }
 0x1fb   : >> { %v1059_v23 = vsel %vm1043_vm9, 1, %v3873_v30 }
 0x1fc   : >> { %v1097_v18 = vpack.c.bf16 %v1084_v27, %v1083_v1  ;;  %v1075_v56 = vadd.s32 %v1059_v23, %v979_v31  ;;  %v1093_v3 = vcvt.s32.f32 %v1077_v29 }
 0x1fd   : >> { %v1024_v32 = vpop.permute.xlu1 %1023 }
 0x1fe   : >> { %vm1044_vm12 = vcmp.eq.s32.totalorder %v3058_v25, %v1024_v32  ;;  %1934 = vmatprep.mubr.bf16.mxu0 %v1097_v18  ;;  %v1091_v39 = vcvt.s32.f32 %v1075_v56 }
 0x1ff   : >> { %v1060_v58 = vsel %vm1044_vm12, 1, %v3873_v30 }
 0x200   : >> { %v1076_v62 = vadd.s32 %v1060_v58, %v980_v61 }
 0x201   : >> { %v1006_v33 = vpop.permute.xlu1 %1005 }
 0x202   : >> { %v1092_v41 = vcvt.s32.f32 %v1076_v62  ;;  %vm1038_vm14 = vcmp.eq.s32.totalorder %v3058_v25, %v1006_v33  ;;  %v3897_v62 = vld [vmem:[#allocation29_spill] sm:$0xff]  ;;  %v3899_v33 = vld [vmem:[#allocation20_spill] sm:$0xff] }
 0x203   : >> { %v1054_v10 = vsel %vm1038_vm14, 1, %v3873_v30 }
 0x204   : >> { %v1070_v12 = vadd.s32 %v1054_v10, %v974_v52  ;;  %v1101_v19 = vpack.c.bf16 %v1092_v41, %v1091_v39  ;;  %v3877_v52 = vld [vmem:[#allocation24_spill] sm:$0xff]  ;;  %v3901_v41 = vld [vmem:[#allocation22_spill] sm:$0xff] }
 0x205   : >> { %v1030_v37 = vpop.permute.xlu1 %1029 }
 0x206   : >> { %v1086_v54 = vcvt.s32.f32 %v1070_v12  ;;  %vm1046_vm15 = vcmp.eq.s32.totalorder %v3058_v25, %v1030_v37  ;;  %1942 = vmatprep.mubr.bf16.mxu1 %v1101_v19  ;;  %v3881_v25 = vld [vmem:[#allocation26_spill] sm:$0xff]  ;;  %v3903_v12 = vld [vmem:[#allocation19_spill] sm:$0xff] }
 0x207   : >> { %v1062_v61 = vsel %vm1046_vm15, 1, %v3873_v30 }
 0x208   : >> { %v1078_v2 = vadd.s32 %v1062_v61, %v3581_v59  ;;  %v1098_v47 = vpack.c.bf16 %v1086_v54, %v1085_v22  ;;  %v2265_v61 = vld [vmem:[#allocation2] sm:$0xff] (%p3660_p10)  }
 0x209   : > { %1946 = vmatprep.subr.bf16.mxu0 (%p3660_p10), %v2265_v61 }
 0x20a   : >> { %v1094_v20 = vcvt.s32.f32 %v1078_v2  ;;  %1935 = vmatmul.mubr.bf16.gmra.mrb[4].mxu0 %v1098_v47  ;;  %v2266_v47 = vld [vmem:[#allocation2 + $0x8] sm:$0xff] (%p3660_p10)  }
 0x20b   : > { %1947 = vmatpush3.bf16.msra.mxu0 (%p3660_p10), %v2265_v61 }
 0x20c   : >> { %v1102_v0 = vpack.c.bf16 %v1094_v20, %v1093_v3  ;;  %1948 = vmatprep.subr.bf16.mxu0 (%p3660_p10), %v2266_v47  ;;  %v2267_v3 = vld [vmem:[#allocation2 + $0x10] sm:$0xff] (%p3660_p10)  }
 0x20e   : >> { %1943 = vmatmul.mubr.bf16.gmra.mrb[4].mxu1 %v1102_v0  ;;  %v2268_v0 = vld [vmem:[#allocation2 + $0x18] sm:$0xff] (%p3660_p10)  }
 0x20f   : > { %1949 = vmatpush3.bf16.msra.mxu0 (%p3660_p10), %v2266_v47 }
 0x210   : > { %1950 = vmatprep.subr.bf16.mxu0 (%p3660_p10), %v2267_v3 }
 0x213   : > { %1951 = vmatpush3.bf16.msra.mxu0 (%p3660_p10), %v2267_v3 }
 0x214   : > { %1952 = vmatprep.subr.bf16.mxu0 (%p3660_p10), %v2268_v0 }
 0x217   : > { %1953 = vmatpush3.bf16.msra.mxu0 (%p3660_p10), %v2268_v0 }
 0x295   : >> { %v1940_v28 = vpop.f32.mrb[0].mxu1  ;;  %v1932_v63 = vpop.f32.mrb[0].mxu0 }
 0x296   : >> { %v3616_v23 = vadd.f32 %v3877_v52, %v1940_v28   ;;  %v1237_v53 = vpop.f32.mrb[1].mxu1  ;;  %v3619_v31 = vadd.f32 %v3879_v45, %v1932_v63   ;;  %v1205_v30 = vpop.f32.mrb[1].mxu0  ;;  %v2273_v52 = vld [vmem:[#allocation5] sm:$0xff] (%p3660_p10)   ;;  %v2274_v63 = vld [vmem:[#allocation5 + $0x8] sm:$0xff] (%p3660_p10)   ;;  %v2275_v45 = vld [vmem:[#allocation5 + $0x10] sm:$0xff] (%p3660_p10)  }
 0x297   : >> { %v3622_v25 = vadd.f32 %v3881_v25, %v1237_v53   ;;  %v1941_v59 = vpop.f32.mrb[2].mxu1  ;;  %v1268_v36 = vadd.f32 %v3883_v35, %v1205_v30   ;;  %v1933_v42 = vpop.f32.mrb[2].mxu0  ;;  %1978 = vmatprep.subr.bf16.mxu1 (%p3660_p10), %v2273_v52  ;;  %v2269_v53 = vld [vmem:[#allocation2 + $0x20] sm:$0xff] (%p3660_p10)  }
 0x298   : >> { %v3878_v34 = vmov %v3616_v23  ;;  %v3880_v44 = vmov %v3619_v31  ;;  %v3626_v22 = vadd.f32 %v3884_v26, %v1941_v59   ;;  %v1240_v60 = vpop.f32.mrb[3].mxu1  ;;  %v3629_v30 = vadd.f32 %v3886_v48, %v1933_v42   ;;  %v1208_v27 = vpop.f32.mrb[3].mxu0  ;;  %v3891_v31 = vld [vmem:[#allocation28_spill] sm:$0xff]  ;;  %1979 = vmatpush3.bf16.msra.mxu1 (%p3660_p10), %v2273_v52  ;;  %1954 = vmatprep.subr.bf16.mxu0 (%p3660_p10), %v2269_v53 }
 0x299   : >> { %v3882_v4 = vmov %v3622_v25  ;;  %v3632_v24 = vadd.f32 %v3888_v11, %v1240_v60   ;;  %v1269_v1 = vadd.f32 %v3890_v38, %v1208_v27   ;;  %1980 = vmatprep.subr.bf16.mxu1 (%p3660_p10), %v2274_v63  ;;  %1955 = vmatpush3.bf16.msra.mxu0 (%p3660_p10), %v2269_v53 }
 0x29a   : >> { %v3885_v40 = vmov %v3626_v22  ;;  %v3887_v55 = vmov %v3629_v30  ;;  %v3915_v25 = vmov %v3882_v4  ;;  %1956 = vmatprep.subr.bf16.mxu0 (%p3660_p10), %v2270_v6 }
 0x29b   : >> { %v3889_v5 = vmov %v3632_v24  ;;  %v3920_v30 = vmov %v3887_v55  ;;  %v1284_v2 = vpack.c.bf16 (%p3660_p10), %v1269_v1, %v1268_v36  ;;  %v1285_v15 = vpack.c.bf16 (%p3660_p10), %v3887_v55, %v3880_v44  ;;  %v2279_v25 = vld [vmem:[#allocation5 + $0x30] sm:$0xff] (%p3660_p10)  }
 0x29c   : > { %1981 = vmatpush3.bf16.msra.mxu1 (%p3660_p10), %v2274_v63  ;;  %v2280_v30 = vld [vmem:[#allocation5 + $0x38] sm:$0xff] (%p3660_p10)  }
 0x29d   : > { %1962 = vmatprep.mubr.bf16.mxu0 (%p3660_p10), %v1284_v2  ;;  %1982 = vmatprep.subr.bf16.mxu1 (%p3660_p10), %v2275_v45 }
 0x29e   : > { %1957 = vmatpush3.bf16.msra.mxu0 (%p3660_p10), %v2270_v6 }
 0x29f   : > { %1958 = vmatprep.subr.bf16.mxu0 (%p3660_p10), %v2271_v8 }
 0x2a0   : > { %1983 = vmatpush3.bf16.msra.mxu1 (%p3660_p10), %v2275_v45 }
 0x2a1   : > { %1984 = vmatprep.subr.bf16.mxu1 (%p3660_p10), %v2276_v7 }
 0x2a2   : > { %1959 = vmatpush3.bf16.msra.mxu0 (%p3660_p10), %v2271_v8 }
 0x2a3   : > { %1960 = vmatprep.subr.bf16.mxu0 (%p3660_p10), %v2272_v13 }
 0x2a4   : > { %1985 = vmatpush3.bf16.msra.mxu1 (%p3660_p10), %v2276_v7 }
 0x2a5   : > { %1986 = vmatprep.subr.bf16.mxu1 (%p3660_p10), %v2277_v9 }
 0x2a6   : > { %1961 = vmatpush3.bf16.msra.mxu0 (%p3660_p10), %v2272_v13 }
 0x2a8   : > { %1987 = vmatpush3.bf16.msra.mxu1 (%p3660_p10), %v2277_v9 }
 0x2a9   : > { %1988 = vmatprep.subr.bf16.mxu1 (%p3660_p10), %v2278_v14  ;;  %1963 = vmatmul.mubr.bf16.vlgmr.msra.gmra.mrb[0].mxu0 (%p3660_p10), %v1285_v15 }
 0x2ac   : > { %1989 = vmatpush3.bf16.msra.mxu1 (%p3660_p10), %v2278_v14 }
 0x2ad   : > { %1990 = vmatprep.subr.bf16.mxu1 (%p3660_p10), %v2279_v25 }
 0x2b0   : > { %1991 = vmatpush3.bf16.msra.mxu1 (%p3660_p10), %v2279_v25 }
 0x2b1   : > { %1992 = vmatprep.subr.bf16.mxu1 (%p3660_p10), %v2280_v30 }
 0x2b4   : > { %1993 = vmatpush3.bf16.msra.mxu1 (%p3660_p10), %v2280_v30 }
 0x2dd   : >> { %v1936_v23 = vpop.f32.mrb[4].mxu0 }
 0x2de   : >> { %v3636_v27 = vadd.f32 %v3891_v31, %v1936_v23   ;;  %v1221_v18 = vpop.f32.mrb[5].mxu0  ;;  %v3913_v23 = vmov %v3878_v34  ;;  %v3921_v31 = vmov %v3880_v44 }
 0x2df   : >> { %v3639_v29 = vadd.f32 %v3893_v49, %v1221_v18   ;;  %v1937_v32 = vpop.f32.mrb[6].mxu0 }
 0x2e0   : >> { %v3892_v46 = vmov %v3636_v27  ;;  %v3642_v26 = vadd.f32 %v3895_v21, %v1937_v32   ;;  %v1224_v58 = vpop.f32.mrb[7].mxu0  ;;  %v3922_v32 = vmov %v1269_v1 }
 0x2e1   : >> { %v3894_v56 = vmov %v3639_v29  ;;  %v3645_v28 = vadd.f32 %v3897_v62, %v1224_v58   ;;  %v1944_v24 = vpop.f32.mrb[4].mxu1  ;;  %v3905_v29 = vld [vmem:[#allocation21_spill] sm:$0xff]  ;;  %v3917_v27 = vmov %v3892_v46 }
 0x2e2   : >> { %v3896_v50 = vmov %v3642_v26  ;;  %v3648_v19 = vadd.f32 %v3899_v33, %v1944_v24   ;;  %v1253_v39 = vpop.f32.mrb[5].mxu1  ;;  %v3914_v24 = vmov %v3889_v5  ;;  %v3923_v33 = vmov %v1268_v36  ;;  %306 = sbr.rel (!%p3660_p10) target bundleno = 93 (0x5d), region = 96 }
 0x2e3   : >> { %v3898_v43 = vmov %v3645_v28  ;;  %v3651_v21 = vadd.f32 %v3901_v41, %v1253_v39   ;;  %v1945_v10 = vpop.f32.mrb[6].mxu1  ;;  %v3916_v26 = vmov %v3896_v50  ;;  %v1287_v17 = vpack.c.bf16 (%p3660_p10), %v3896_v50, %v3892_v46 }
 0x2e4   : >> { %v3900_v57 = vmov %v3648_v19  ;;  %v3654_v18 = vadd.f32 %v3903_v12, %v1945_v10   ;;  %v1256_v22 = vpop.f32.mrb[7].mxu1  ;;  %v3918_v28 = vmov %v3898_v43  ;;  %v1286_v16 = vpack.c.bf16 (%p3660_p10), %v3898_v43, %v3894_v56 }
 0x2e5   : >> { %v3902_v51 = vmov %v3651_v21  ;;  %v3657_v20 = vadd.f32 %v3905_v29, %v1256_v22   ;;  %v3909_v19 = vmov %v3900_v57  ;;  %v3912_v22 = vmov %v3885_v40 }
 0x2e6   : >> { %v3904_v37 = vmov %v3654_v18  ;;  %v3911_v21 = vmov %v3902_v51  ;;  %v3919_v29 = vmov %v3894_v56  ;;  %1966 = vmatprep.mubr.bf16.mxu0 (%p3660_p10), %v1286_v16  ;;  %v1288_v19 = vpack.c.bf16 (%p3660_p10), %v3889_v5, %v3882_v4  ;;  %v1842_v4 = vld [vmem:[%s3805_s3] ss:$0 sm:$0xff] (%p3660_p10) }
 0x2e7   : >> { %v3906_v54 = vmov %v3657_v20  ;;  %v3908_v18 = vmov %v3904_v37  ;;  %1967 = vmatmul.mubr.bf16.gmra.mrb[4].mxu0 (%p3660_p10), %v1287_v17  ;;  %v1291_v44 = vpack.c.bf16 (%p3660_p10), %v3904_v37, %v3900_v57  ;;  %v1851_v17 = vld [vmem:[%s3807_s5] ss:$0 sm:$0xff] (%p3660_p10) }
 0x2e8   : >> { %v3910_v20 = vmov %v3906_v54  ;;  %1970 = vmatprep.mubr.bf16.mxu0 (%p3660_p10), %v1288_v19  ;;  %v1290_v28 = vpack.c.bf16 (%p3660_p10), %v3906_v54, %v3902_v51 }
 0x2e9   : > { %v1289_v20 = vpack.c.bf16 %v3885_v40, %v3878_v34 }
 0x2ef   : > { %1971 = vmatmul.mubr.bf16.gmra.mrb[8].mxu0 %v1289_v20 }
 0x2f0   : > { %1974 = vmatprep.mubr.bf16.mxu0 %v1290_v28 }
 0x2f7   : > { %1975 = vmatmul.mubr.bf16.gmra.mrb[12].mxu0 %v1291_v44 }
 0x37c   : > { %v1964_v34 = vpop.f32.mrb[0].mxu0 }
 0x37d   : > { %v1406_v59 = vadd.f32 %v1964_v34, %v1842_v4  ;;  %v1397_v35 = vpop.f32.mrb[1].mxu0 }
 0x37e   : > { %v1398_v36 = vadd.f32 %v1842_v4, %v1397_v35  ;;  %v1965_v26 = vpop.f32.mrb[2].mxu0 }
 0x37f   : > { %v1409_v40 = vadd.f32 %v1965_v26, %v1842_v4  ;;  %v1400_v42 = vpop.f32.mrb[3].mxu0  ;;  %v1462_v48 = vmax.f32 %v1406_v59, 0.0 }
 0x380   : > { %v1401_v60 = vadd.f32 %v1842_v4, %v1400_v42  ;;  %v1460_v11 = vmax.f32 %v1398_v36, 0.0 }
 0x381   : > { %v1463_v55 = vmax.f32 %v1409_v40, 0.0 }
 0x382   : > { %v1461_v5 = vmax.f32 %v1401_v60, 0.0 }
 0x383   : > { %v1477_v27 = vpack.c.bf16 %v1463_v55, %v1462_v48 }
 0x384   : > { %v1476_v1 = vpack.c.bf16 %v1461_v5, %v1460_v11 }
 0x386   : > { %1994 = vmatprep.mubr.bf16.mxu1 %v1476_v1 }
 0x387   : > { %1995 = vmatmul.mubr.bf16.vlgmr.msra.gmra.mrb[0].mxu1 %v1477_v27 }
 0x3ba   : > { %v1968_v38 = vpop.f32.mrb[4].mxu0 }
 0x3bb   : > { %v1422_v23 = vadd.f32 %v1968_v38, %v1842_v4  ;;  %v1413_v31 = vpop.f32.mrb[5].mxu0 }
 0x3bc   : > { %v1414_v46 = vadd.f32 %v1842_v4, %v1413_v31  ;;  %v1969_v18 = vpop.f32.mrb[6].mxu0 }
 0x3bd   : > { %v1425_v49 = vadd.f32 %v1969_v18, %v1842_v4  ;;  %v1416_v56 = vpop.f32.mrb[7].mxu0  ;;  %v1466_v21 = vmax.f32 %v1422_v23, 0.0 }
 0x3be   : > { %v1417_v32 = vadd.f32 %v1842_v4, %v1416_v56  ;;  %v1464_v58 = vmax.f32 %v1414_v46, 0.0 }
 0x3bf   : > { %v1467_v50 = vmax.f32 %v1425_v49, 0.0 }
 0x3c0   : > { %v1465_v62 = vmax.f32 %v1417_v32, 0.0 }
 0x3c1   : > { %v1479_v43 = vpack.c.bf16 %v1467_v50, %v1466_v21 }
 0x3c2   : > { %v1478_v24 = vpack.c.bf16 %v1465_v62, %v1464_v58  ;;  %v1972_v33 = vpop.f32.mrb[8].mxu0 }
 0x3c3   : > { %v1438_v57 = vadd.f32 %v1972_v33, %v1842_v4  ;;  %v1429_v39 = vpop.f32.mrb[9].mxu0 }
 0x3c4   : > { %v1430_v41 = vadd.f32 %v1842_v4, %v1429_v39  ;;  %v1973_v51 = vpop.f32.mrb[10].mxu0  ;;  %1998 = vmatprep.mubr.bf16.mxu1 %v1478_v24 }
 0x3c5   : > { %v1441_v10 = vadd.f32 %v1973_v51, %v1842_v4  ;;  %v1432_v12 = vpop.f32.mrb[11].mxu0  ;;  %1999 = vmatmul.mubr.bf16.gmra.mrb[4].mxu1 %v1479_v43  ;;  %v1470_v22 = vmax.f32 %v1438_v57, 0.0 }
 0x3c6   : > { %v1433_v37 = vadd.f32 %v1842_v4, %v1432_v12  ;;  %v1468_v54 = vmax.f32 %v1430_v41, 0.0 }
 0x3c7   : > { %v1471_v29 = vmax.f32 %v1441_v10, 0.0 }
 0x3c8   : > { %v1469_v61 = vmax.f32 %v1433_v37, 0.0 }
 0x3c9   : > { %v1481_v2 = vpack.c.bf16 %v1471_v29, %v1470_v22 }
 0x3ca   : > { %v1480_v47 = vpack.c.bf16 %v1469_v61, %v1468_v54  ;;  %v1976_v3 = vpop.f32.mrb[12].mxu0 }
 0x3cb   : > { %v1454_v0 = vadd.f32 %v1976_v3, %v1842_v4  ;;  %v1445_v52 = vpop.f32.mrb[13].mxu0 }
 0x3cc   : > { %v1446_v63 = vadd.f32 %v1842_v4, %v1445_v52  ;;  %v1977_v53 = vpop.f32.mrb[14].mxu0  ;;  %2002 = vmatprep.mubr.bf16.mxu1 %v1480_v47 }
 0x3cd   : > { %v1457_v45 = vadd.f32 %v1977_v53, %v1842_v4  ;;  %v1448_v6 = vpop.f32.mrb[15].mxu0  ;;  %2003 = vmatmul.mubr.bf16.gmra.mrb[8].mxu1 %v1481_v2  ;;  %v1474_v8 = vmax.f32 %v1454_v0, 0.0 }
 0x3ce   : > { %v1449_v7 = vadd.f32 %v1842_v4, %v1448_v6  ;;  %v1472_v13 = vmax.f32 %v1446_v63, 0.0 }
 0x3cf   : > { %v1475_v9 = vmax.f32 %v1457_v45, 0.0 }
 0x3d0   : > { %v1473_v14 = vmax.f32 %v1449_v7, 0.0 }
 0x3d1   : > { %v1483_v15 = vpack.c.bf16 %v1475_v9, %v1474_v8 }
 0x3d2   : > { %v1482_v16 = vpack.c.bf16 %v1473_v14, %v1472_v13 }
 0x3d4   : > { %2006 = vmatprep.mubr.bf16.mxu1 %v1482_v16 }
 0x3d5   : > { %2007 = vmatmul.mubr.bf16.gmra.mrb[12].mxu1 %v1483_v15 }
 0x45a   : > { %v1996_v19 = vpop.f32.mrb[0].mxu1 }
 0x45b   : > { %v1598_v20 = vadd.f32 %v1996_v19, %v1851_v17  ;;  %v1589_v28 = vpop.f32.mrb[1].mxu1 }
 0x45c   : > { %v1590_v44 = vadd.f32 %v1851_v17, %v1589_v28  ;;  %v1997_v25 = vpop.f32.mrb[2].mxu1 }
 0x45d   : > { %1654 = vst [vmem:[%s2756_s18 + $0x10] sm:$0xff] %v1598_v20  ;;  %v1601_v30 = vadd.f32 %v1997_v25, %v1851_v17  ;;  %v1592_v4 = vpop.f32.mrb[3].mxu1 }
 0x45e   : > { %1652 = vst [vmem:[%s2756_s18] sm:$0xff] %v1590_v44  ;;  %v1593_v34 = vadd.f32 %v1851_v17, %v1592_v4 }
 0x45f   : > { %1655 = vst [vmem:[%s2756_s18 + $0x18] sm:$0xff] %v1601_v30 }
 0x460   : > { %1653 = vst [vmem:[%s2756_s18 + $0x8] sm:$0xff] %v1593_v34 }
 0x498   : > { %v2000_v59 = vpop.f32.mrb[4].mxu1 }
 0x499   : > { %v1614_v35 = vadd.f32 %v2000_v59, %v1851_v17  ;;  %v1605_v36 = vpop.f32.mrb[5].mxu1 }
 0x49a   : > { %v1606_v26 = vadd.f32 %v1851_v17, %v1605_v36  ;;  %v2001_v40 = vpop.f32.mrb[6].mxu1 }
 0x49b   : > { %1658 = vst [vmem:[%s2756_s18 + $0x30] sm:$0xff] %v1614_v35  ;;  %v1617_v42 = vadd.f32 %v2001_v40, %v1851_v17  ;;  %v1608_v60 = vpop.f32.mrb[7].mxu1 }
 0x49c   : > { %1656 = vst [vmem:[%s2756_s18 + $0x20] sm:$0xff] %v1606_v26  ;;  %v1609_v48 = vadd.f32 %v1851_v17, %v1608_v60 }
 0x49d   : > { %1659 = vst [vmem:[%s2756_s18 + $0x38] sm:$0xff] %v1617_v42 }
 0x49e   : > { %1657 = vst [vmem:[%s2756_s18 + $0x28] sm:$0xff] %v1609_v48 }
 0x4a0   : > { %v2004_v55 = vpop.f32.mrb[8].mxu1 }
 0x4a1   : > { %v1630_v11 = vadd.f32 %v2004_v55, %v1851_v17  ;;  %v1621_v5 = vpop.f32.mrb[9].mxu1 }
 0x4a2   : > { %v1622_v27 = vadd.f32 %v1851_v17, %v1621_v5  ;;  %v2005_v38 = vpop.f32.mrb[10].mxu1 }
 0x4a3   : > { %1662 = vst [vmem:[%s2756_s18 + $0x50] sm:$0xff] %v1630_v11  ;;  %v1633_v1 = vadd.f32 %v2005_v38, %v1851_v17  ;;  %v1624_v23 = vpop.f32.mrb[11].mxu1 }
 0x4a4   : > { %1660 = vst [vmem:[%s2756_s18 + $0x40] sm:$0xff] %v1622_v27  ;;  %v1625_v31 = vadd.f32 %v1851_v17, %v1624_v23 }
 0x4a5   : > { %1663 = vst [vmem:[%s2756_s18 + $0x58] sm:$0xff] %v1633_v1 }
 0x4a6   : > { %1661 = vst [vmem:[%s2756_s18 + $0x48] sm:$0xff] %v1625_v31 }
 0x4a8   : > { %v2008_v46 = vpop.f32.mrb[12].mxu1 }
 0x4a9   : > { %v1646_v18 = vadd.f32 %v2008_v46, %v1851_v17  ;;  %v1637_v49 = vpop.f32.mrb[13].mxu1 }
 0x4aa   : > { %v1638_v56 = vadd.f32 %v1851_v17, %v1637_v49  ;;  %v2009_v32 = vpop.f32.mrb[14].mxu1 }
 0x4ab   : > { %1666 = vst [vmem:[%s2756_s18 + $0x70] sm:$0xff] %v1646_v18  ;;  %v1649_v21 = vadd.f32 %v2009_v32, %v1851_v17  ;;  %v1640_v50 = vpop.f32.mrb[15].mxu1 }
 0x4ac   : > { %1664 = vst [vmem:[%s2756_s18 + $0x60] sm:$0xff] %v1638_v56  ;;  %v1641_v58 = vadd.f32 %v1851_v17, %v1640_v50 }
 0x4ad   : > { %1667 = vst [vmem:[%s2756_s18 + $0x78] sm:$0xff] %v1649_v21 }
 0x4ae   : > { %1665 = vst [vmem:[%s2756_s18 + $0x68] sm:$0xff] %v1641_v58 }
 0x4af   : > { %2350 = shalt.err (!%p2347_p13)
}
 0x4b0   : > { %s2351_s14 = scalar_lea.hbm %s3752_s28, 2048  ;;  %s2355_s29 = scalar_lea.hbm %s3808_s6, 4096 }
 0x4b1   : > { %p2352_p5 = scmp.ne.s32.totalorder %s3752_s28, %s2351_s14  ;;  %p2356_p9 = scmp.lt.u32.totalorder %s3752_s28, %s3808_s6 }
 0x4b2   : > { %p2357_p12 = scmp.lt.u32.totalorder %s2355_s29, %s2351_s14  ;;  %p2359_p1 = scmp.lt.u32.totalorder %s2351_s14, %s3752_s28 }
 0x4b3   : > { %p2353_p0 = pnand %p2352_p5, %p3924_p2 }
 0x4b4   : > { %p2358_p10 = por %p2357_p12, %p2356_p9 }
 0x4b5   : > { %p2354_p6 = pneg %p2353_p0 }
 0x4b6   : > { %p2360_p3 = por %p2359_p1, %p2358_p10 }
 0x4b8   : > { %p2361_p4 = pnand %p2360_p3, %p2354_p6 }
 0x4ba   : > { %2364 = shalt.err (!%p2361_p4)
}
 0x4bb   : > { %s2558_s17 = smov 128   ;;  %s2559_s20 = smov 8  }
 0x4bc   : > { %2034 = dma.vmem_to_hbm [thread:$0]  (%p3924_p2), %s3754_s19, 2048, %s3752_s28, %s3761_s25, %s2558_s17, %s2558_s17, %s2559_s20  }
 0x4bd PF: > { %p2051_p7 = scmp.ge.s32.totalorder %s2475_s24, 2  ;;  %s1697_s26 = sand.u32 1, %s2463_s21  }
 0x4be   : > { %p3925_p8 = scmp.ne.s32.totalorder %s3829_s8, 0  ;;  %s1698_s11 = scalar_lea.sflag [#allocation4], %s1697_s26 }
 0x4c0   : > { %p2044_p11 = pnand %p2051_p7, %p3925_p8 }
 0x4c2   : > { %2458 = dma.done.wait (!%p2044_p11), %s1698_s11, 2048  }
 0x4c3   : > { %2460 = vsyncadd (!%p2044_p11), %s1698_s11, 4294965248  ;;  %p18_p13 = scmp.ge.s32.totalorder %s2620_s27, 4   ;;  %s3926_s21 = smov %s2467_s22 }
 0x4c4   : > { %s3927_s22 = smov %s2471_s23  ;;  %s3928_s23 = smov %s2631_s30 }
 0x4c5   : > { %s3929_s24 = smov %s2620_s27  ;;  %20 = sbr.rel (!%p18_p13) target bundleno = 5 (0x5), region = 107 }
 0x4cc   :  { %1703 = vsyncpa [#allocation3], 1 }
 0x4cd   :  { %1705 = vsyncpa [#allocation3 + $0x1], 1 }
 0x4ce   :  { %1706 = vsyncpa [#allocation6], 1 }
 0x4cf   :  { %1707 = vsyncpa [#allocation4], 1 }
 0x4d0   :  { %1709 = vsyncpa [#allocation4 + $0x1], 1 }

</bundles_post_ra>
